<compile_context>
chip_gen: v6e
topology: v6e:2x2x1
jax: 0.10.0
libtpu: 0.0.40
codegen_flags: <defaults>
</compile_context>

<pallas_src>
import functools

import jax
import jax.numpy as jnp
from jax import lax
from jax.experimental import pallas as pl
from jax.experimental.pallas import tpu as pltpu


def _round_up(x, m):
    return (x + m - 1) // m * m


# ----------------------------------------------------------------------------
# Pallas kernel: fused conv3d (tap accumulation) + bias + ReLU
#   x_hbm : (Cin_p, L)            bf16, HBM (pl.ANY), lane-guarded flattened input
#   w_ref : (K^3, Cout_p, Cin_p)  bf16, VMEM resident
#   b_ref : (Cout_p, 1)           f32,  VMEM resident
#   o_ref : (Cout_p, TM)          f32,  lane-dense output block
#   xbuf  : (2, Cin_p, TM+2*GR)   bf16, double-buffered halo'd window
# ----------------------------------------------------------------------------
def _conv3d_tap_kernel(x_hbm, w_ref, b_ref, o_ref, xbuf, sem, *, taps, relu):
    i = pl.program_id(0)
    nblk = pl.num_programs(0)
    tm = o_ref.shape[-1]
    win = xbuf.shape[-1]

    def fetch(blk, slot):
        pltpu.make_async_copy(
            x_hbm.at[:, pl.ds(blk * tm, win)], xbuf.at[slot], sem.at[slot]
        ).start()

    # prologue: fetch the first halo'd window
    @pl.when(i == 0)
    def _():
        fetch(0, 0)

    slot = i % 2

    # wait for the current window
    pltpu.make_async_copy(
        x_hbm.at[:, pl.ds(0, win)], xbuf.at[slot], sem.at[slot]
    ).wait()

    # prefetch the next window into the other slot (hidden behind this step's compute)
    @pl.when(i + 1 < nblk)
    def _():
        fetch(i + 1, 1 - slot)

    buf = xbuf[slot]                                     # (Cin_p, win) bf16
    acc = jnp.zeros(o_ref.shape, jnp.float32)
    for t, off in enumerate(taps):                       # K^3 static taps, unrolled
        xs = buf[:, off:off + tm]                        # shifted window (Cin_p, TM)
        acc = acc + jnp.dot(w_ref[t], xs, preferred_element_type=jnp.float32)
    acc = acc + b_ref[...]                               # (Cout_p, 1) broadcast over lanes
    if relu:
        acc = jnp.maximum(acc, 0.0)
    o_ref[...] = acc.astype(o_ref.dtype)


# ----------------------------------------------------------------------------
# Conv3d (stride 1, 'same' padding, odd K) + optional ReLU, via the tap kernel
# ----------------------------------------------------------------------------
def conv3d_relu_pallas(x, w, b, *, block_m=512, apply_relu=True):
    """x: (N, Cin, D, H, W) f32; w: (Cout, Cin, K, K, K); b: (Cout,).
    Returns relu(conv3d(x) + b), shape (N, Cout, D, H, W)."""
    N, Cin, D, H, W = x.shape
    Cout, Cin_w, K = w.shape[0], w.shape[1], w.shape[2]
    assert Cin_w == Cin and w.shape[3] == K and w.shape[4] == K
    P = (K - 1) // 2
    Dp, Hp, Wp = D + 2 * P, H + 2 * P, W + 2 * P

    CIN_P = _round_up(Cin, 8)                  # channels padded to 8 sublanes
    COUT_P = _round_up(Cout, 8)
    M = N * Dp * Hp * Wp                       # flattened padded output positions
    G = P * (Hp * Wp + Wp + 1)                 # max |tap offset| in flattened coords
    GR = _round_up(max(G, 1), 128)             # lane guard on each side
    TM = max(128, min(_round_up(block_m, 128), _round_up(M, 128)))
    M_pad = _round_up(M, TM)
    nblk = M_pad // TM
    WIN = TM + 2 * GR
    L = M_pad + 2 * GR

    # channel-major, zero-guarded, flattened-padded-spatial input, bf16
    xp = jnp.pad(x, ((0, 0), (0, 0), (P, P), (P, P), (P, P)))
    xt = jnp.transpose(xp, (1, 0, 2, 3, 4)).reshape(Cin, M).astype(jnp.bfloat16)
    x_lanes = jnp.zeros((CIN_P, L), jnp.bfloat16)
    x_lanes = x_lanes.at[:Cin, GR:GR + M].set(xt)

    # per-tap weights (K^3, Cout_p, Cin_p) bf16; bias (Cout_p, 1) f32
    wt = jnp.transpose(w, (2, 3, 4, 0, 1)).reshape(K * K * K, Cout, Cin)
    w_k = jnp.zeros((K * K * K, COUT_P, CIN_P), jnp.bfloat16)
    w_k = w_k.at[:, :Cout, :Cin].set(wt.astype(jnp.bfloat16))
    b_k = jnp.zeros((COUT_P, 1), jnp.float32).at[:Cout, 0].set(b.astype(jnp.float32))

    # static in-window lane offset of each (kd, kh, kw) tap
    taps = tuple(GR + (kd - P) * Hp * Wp + (kh - P) * Wp + (kw - P)
                 for kd in range(K) for kh in range(K) for kw in range(K))

    out = pl.pallas_call(
        functools.partial(_conv3d_tap_kernel, taps=taps, relu=apply_relu),
        out_shape=jax.ShapeDtypeStruct((COUT_P, M_pad), jnp.float32),
        grid_spec=pltpu.PrefetchScalarGridSpec(
            num_scalar_prefetch=0,
            grid=(nblk,),
            in_specs=[
                pl.BlockSpec(memory_space=pl.ANY),                          # input stays in HBM
                pl.BlockSpec((K * K * K, COUT_P, CIN_P), lambda i: (0, 0, 0)),  # weights resident
                pl.BlockSpec((COUT_P, 1), lambda i: (0, 0)),                # bias resident
            ],
            out_specs=pl.BlockSpec((COUT_P, TM), lambda i: (0, i)),         # lane-dense output
            scratch_shapes=[
                pltpu.VMEM((2, CIN_P, WIN), jnp.bfloat16),                  # halo'd window, 2 slots
                pltpu.SemaphoreType.DMA((2,)),
            ],
        ),
        # TODO(synk): cross-step manual double-buffering assumes a sequential grid, so this
        # stays "arbitrary"; a shard-safe prologue would be needed to enable v7x megacore.
        compiler_params=pltpu.CompilerParams(dimension_semantics=("arbitrary",)),
    )(x_lanes, w_k, b_k)

    # drop channel/row padding, keep only valid (non-halo) spatial positions
    y = out[:Cout, :M].reshape(Cout, N, Dp, Hp, Wp)
    y = y[:, :, P:P + D, P:P + H, P:P + W]
    return jnp.transpose(y, (1, 0, 2, 3, 4))


# ----------------------------------------------------------------------------
# make_dense module: params, forward (Pallas) and pure-JAX reference
# ----------------------------------------------------------------------------
def init_make_dense(key, nChannels, GrowthRate, kernel_size=3):
    kw_key, kb_key = jax.random.split(key)
    fan_in = nChannels * kernel_size ** 3
    bound = 1.0 / (fan_in ** 0.5)
    w = jax.random.uniform(kw_key, (GrowthRate, nChannels) + (kernel_size,) * 3,
                           jnp.float32, -bound, bound)
    b = jax.random.uniform(kb_key, (GrowthRate,), jnp.float32, -bound, bound)
    return {"conv_w": w, "conv_b": b}


def make_dense_forward(params, x):
    """PyTorch make_dense.forward: cat([x, relu(conv3d(x))], dim=1)."""
    y = conv3d_relu_pallas(x, params["conv_w"], params["conv_b"])
    return jnp.concatenate([x, y], axis=1)


def make_dense_ref(params, x):
    w, b = params["conv_w"], params["conv_b"]
    K = w.shape[2]
    P = (K - 1) // 2
    out = lax.conv_general_dilated(
        x, w, window_strides=(1, 1, 1), padding=[(P, P)] * 3,
        dimension_numbers=("NCDHW", "OIDHW", "NCDHW"),
        precision=lax.Precision.HIGHEST)
    out = jnp.maximum(out + b.reshape(1, -1, 1, 1, 1), 0.0)
    return jnp.concatenate([x, out], axis=1)


# ----------------------------------------------------------------------------
if __name__ == "__main__":
    key = jax.random.PRNGKey(0)
    configs = [
        # (nChannels, GrowthRate, kernel_size, N, D, H, W)
        (6, 4, 3, 2, 8, 8, 8),
        (3, 6, 3, 1, 6, 10, 12),     # non-cube spatial, M not a multiple of TM
    ]
    for (C, growth, K, N, D, H, W) in configs:
        key, kp, kx = jax.random.split(key, 3)
        params = init_make_dense(kp, C, growth, K)
        x = jax.random.normal(kx, (N, C, D, H, W), jnp.float32)

        out = jax.block_until_ready(jax.jit(make_dense_forward)(params, x))
        assert out.shape == (N, C + growth, D, H, W), out.shape
        assert bool(jnp.isfinite(out).all())

        ref = jax.block_until_ready(make_dense_ref(params, x))
        # passthrough half of the concat must be exact
        pass_err = float(jnp.max(jnp.abs(out[:, :C] - x)))
        assert pass_err == 0.0, pass_err
        # conv half: bf16 MXU inputs vs f32 HIGHEST-precision reference
        conv_err = float(jnp.max(jnp.abs(out[:, C:] - ref[:, C:])))
        assert conv_err < 5e-2, f"max abs err vs reference: {conv_err}"

    print("KERNEL_OK")
</pallas_src>

<mosaic_0001>
module attributes {stable_mosaic.version = 11 : i64} {
  func.func @_conv3d_tap_kernel(%arg0: i32, %arg1: memref<8x2304xbf16, #tpu.memory_space<any>>, %arg2: memref<27x8x8xbf16, #tpu.memory_space<vmem>>, %arg3: memref<8x1xf32, #tpu.memory_space<vmem>>, %arg4: memref<8x512xf32, #tpu.memory_space<vmem>>, %arg5: memref<2x8x768xbf16, #tpu.memory_space<vmem>>, %arg6: memref<2x!tpu.dma_semaphore, #tpu.memory_space<semaphore_mem>>) attributes {dimension_semantics = [#tpu.dimension_semantics<arbitrary>], iteration_bounds = array<i64: 4>, scalar_prefetch = 0 : i64, scratch_operands = 2 : i64, tpu.core_type = #tpu.core_type<tc>, window_params = [{}, {pipeline_mode = #tpu.pipeline_mode<synchronous>, transform_indices = @transform_1, window_bounds = array<i64: 27, 8, 8>}, {pipeline_mode = #tpu.pipeline_mode<synchronous>, transform_indices = @transform_2, window_bounds = array<i64: 8, 1>}, {transform_indices = @transform_3, window_bounds = array<i64: 8, 512>}]} {
    %c0_i32 = arith.constant 0 : i32
    %0 = arith.cmpi eq, %arg0, %c0_i32 : i32
    %1 = arith.extui %0 : i1 to i32
    %c0_i32_0 = arith.constant 0 : i32
    %2 = arith.cmpi ne, %1, %c0_i32_0 : i32
    scf.if %2 {
      %c0_i32_99 = arith.constant 0 : i32
      %c0_i32_100 = arith.constant 0 : i32
      %c0_i32_101 = arith.constant 0 : i32
      %c0_i32_102 = arith.constant 0 : i32
      %167 = tpu.memref_slice %arg1[%c0_i32_101, %c0_i32_102] : memref<8x2304xbf16, #tpu.memory_space<any>> -> memref<8x768xbf16, #tpu.memory_space<any>>
      %c0_i32_103 = arith.constant 0 : i32
      %c0_i32_104 = arith.constant 0 : i32
      %168 = tpu.memref_slice %arg5[%c0_i32_99, %c0_i32_103, %c0_i32_104] : memref<2x8x768xbf16, #tpu.memory_space<vmem>> -> memref<1x8x768xbf16, #tpu.memory_space<vmem>>
      %169 = tpu.memref_squeeze %168 : memref<1x8x768xbf16, #tpu.memory_space<vmem>> -> memref<8x768xbf16, #tpu.memory_space<vmem>>
      %170 = tpu.memref_slice %arg6[%c0_i32_100] : memref<2x!tpu.dma_semaphore, #tpu.memory_space<semaphore_mem>> -> memref<1x!tpu.dma_semaphore, #tpu.memory_space<semaphore_mem>>
      %171 = tpu.memref_squeeze %170 : memref<1x!tpu.dma_semaphore, #tpu.memory_space<semaphore_mem>> -> memref<!tpu.dma_semaphore, #tpu.memory_space<semaphore_mem>>
      tpu.enqueue_dma source(%167 : memref<8x768xbf16, #tpu.memory_space<any>>) target(%169 : memref<8x768xbf16, #tpu.memory_space<vmem>>) target_semaphore(%171 : memref<!tpu.dma_semaphore, #tpu.memory_space<semaphore_mem>>)
    } else {
    }
    %c2_i32 = arith.constant 2 : i32
    %c0_i32_1 = arith.constant 0 : i32
    %3 = arith.cmpi eq, %c2_i32, %c0_i32_1 : i32
    %c1_i32 = arith.constant 1 : i32
    %4 = arith.select %3, %c1_i32, %c2_i32 : i32
    %5 = arith.remsi %arg0, %4 : i32
    %c0_i32_2 = arith.constant 0 : i32
    %6 = arith.cmpi ne, %5, %c0_i32_2 : i32
    %c0_i32_3 = arith.constant 0 : i32
    %7 = arith.cmpi slt, %5, %c0_i32_3 : i32
    %c0_i32_4 = arith.constant 0 : i32
    %8 = arith.cmpi slt, %4, %c0_i32_4 : i32
    %9 = arith.xori %7, %8 : i1
    %10 = arith.andi %9, %6 : i1
    %11 = arith.addi %5, %4 : i32
    %12 = arith.select %10, %11, %5 : i32
    %c0_i32_5 = arith.constant 0 : i32
    %c0_i32_6 = arith.constant 0 : i32
    %13 = tpu.memref_slice %arg1[%c0_i32_5, %c0_i32_6] : memref<8x2304xbf16, #tpu.memory_space<any>> -> memref<8x768xbf16, #tpu.memory_space<any>>
    %c0_i32_7 = arith.constant 0 : i32
    %c0_i32_8 = arith.constant 0 : i32
    %14 = tpu.memref_slice %arg5[%12, %c0_i32_7, %c0_i32_8] : memref<2x8x768xbf16, #tpu.memory_space<vmem>> -> memref<1x8x768xbf16, #tpu.memory_space<vmem>>
    %15 = tpu.memref_squeeze %14 : memref<1x8x768xbf16, #tpu.memory_space<vmem>> -> memref<8x768xbf16, #tpu.memory_space<vmem>>
    %16 = tpu.memref_slice %arg6[%12] : memref<2x!tpu.dma_semaphore, #tpu.memory_space<semaphore_mem>> -> memref<1x!tpu.dma_semaphore, #tpu.memory_space<semaphore_mem>>
    %17 = tpu.memref_squeeze %16 : memref<1x!tpu.dma_semaphore, #tpu.memory_space<semaphore_mem>> -> memref<!tpu.dma_semaphore, #tpu.memory_space<semaphore_mem>>
    tpu.wait_dma2 semaphore(%17 : memref<!tpu.dma_semaphore, #tpu.memory_space<semaphore_mem>>) src(%13 : memref<8x768xbf16, #tpu.memory_space<any>>) dst(%15 : memref<8x768xbf16, #tpu.memory_space<vmem>>)
    %c1_i32_9 = arith.constant 1 : i32
    %18 = arith.addi %arg0, %c1_i32_9 : i32
    %c4_i32 = arith.constant 4 : i32
    %19 = arith.cmpi slt, %18, %c4_i32 : i32
    %20 = arith.extui %19 : i1 to i32
    %c0_i32_10 = arith.constant 0 : i32
    %21 = arith.cmpi ne, %20, %c0_i32_10 : i32
    scf.if %21 {
      %c1_i32_99 = arith.constant 1 : i32
      %167 = arith.addi %arg0, %c1_i32_99 : i32
      %c1_i32_100 = arith.constant 1 : i32
      %168 = arith.subi %c1_i32_100, %12 : i32
      %c512_i32 = arith.constant 512 : i32
      %169 = arith.muli %167, %c512_i32 : i32
      %c0_i32_101 = arith.constant 0 : i32
      %170 = tpu.memref_slice %arg1[%c0_i32_101, %169] : memref<8x2304xbf16, #tpu.memory_space<any>> -> memref<8x768xbf16, #tpu.memory_space<any>>
      %c0_i32_102 = arith.constant 0 : i32
      %c0_i32_103 = arith.constant 0 : i32
      %171 = tpu.memref_slice %arg5[%168, %c0_i32_102, %c0_i32_103] : memref<2x8x768xbf16, #tpu.memory_space<vmem>> -> memref<1x8x768xbf16, #tpu.memory_space<vmem>>
      %172 = tpu.memref_squeeze %171 : memref<1x8x768xbf16, #tpu.memory_space<vmem>> -> memref<8x768xbf16, #tpu.memory_space<vmem>>
      %173 = tpu.memref_slice %arg6[%168] : memref<2x!tpu.dma_semaphore, #tpu.memory_space<semaphore_mem>> -> memref<1x!tpu.dma_semaphore, #tpu.memory_space<semaphore_mem>>
      %174 = tpu.memref_squeeze %173 : memref<1x!tpu.dma_semaphore, #tpu.memory_space<semaphore_mem>> -> memref<!tpu.dma_semaphore, #tpu.memory_space<semaphore_mem>>
      tpu.enqueue_dma source(%170 : memref<8x768xbf16, #tpu.memory_space<any>>) target(%172 : memref<8x768xbf16, #tpu.memory_space<vmem>>) target_semaphore(%174 : memref<!tpu.dma_semaphore, #tpu.memory_space<semaphore_mem>>)
    } else {
    }
    %22 = arith.index_cast %12 : i32 to index
    %c0 = arith.constant 0 : index
    %c0_11 = arith.constant 0 : index
    %23 = vector.load %arg5[%22, %c0, %c0_11] : memref<2x8x768xbf16, #tpu.memory_space<vmem>>, vector<1x8x768xbf16>
    %24 = vector.shape_cast %23 : vector<1x8x768xbf16> to vector<8x768xbf16>
    %cst = arith.constant 0.000000e+00 : f32
    %25 = vector.broadcast %cst : f32 to vector<8x512xf32>
    %26 = vector.extract_strided_slice %24 {offsets = [0, 17], sizes = [8, 512], strides = [1, 1]} : vector<8x768xbf16> to vector<8x512xbf16>
    %c0_12 = arith.constant 0 : index
    %c0_13 = arith.constant 0 : index
    %c0_14 = arith.constant 0 : index
    %27 = vector.load %arg2[%c0_12, %c0_13, %c0_14] : memref<27x8x8xbf16, #tpu.memory_space<vmem>>, vector<1x8x8xbf16>
    %28 = vector.shape_cast %27 : vector<1x8x8xbf16> to vector<8x8xbf16>
    %cst_15 = arith.constant dense<0.000000e+00> : vector<8x512xf32>
    %29 = tpu.matmul %28, %26, %cst_15 {dimension_numbers = #tpu.dot_dimension_numbers<[1], [0], [0], [1], [0, 0, 1, 1], [], []>} : vector<8x8xbf16>, vector<8x512xbf16>, vector<8x512xf32> -> vector<8x512xf32>
    %30 = arith.addf %25, %29 : vector<8x512xf32>
    %31 = vector.extract_strided_slice %24 {offsets = [0, 18], sizes = [8, 512], strides = [1, 1]} : vector<8x768xbf16> to vector<8x512xbf16>
    %c1 = arith.constant 1 : index
    %c0_16 = arith.constant 0 : index
    %c0_17 = arith.constant 0 : index
    %32 = vector.load %arg2[%c1, %c0_16, %c0_17] : memref<27x8x8xbf16, #tpu.memory_space<vmem>>, vector<1x8x8xbf16>
    %33 = vector.shape_cast %32 : vector<1x8x8xbf16> to vector<8x8xbf16>
    %cst_18 = arith.constant dense<0.000000e+00> : vector<8x512xf32>
    %34 = tpu.matmul %33, %31, %cst_18 {dimension_numbers = #tpu.dot_dimension_numbers<[1], [0], [0], [1], [0, 0, 1, 1], [], []>} : vector<8x8xbf16>, vector<8x512xbf16>, vector<8x512xf32> -> vector<8x512xf32>
    %35 = arith.addf %30, %34 : vector<8x512xf32>
    %36 = vector.extract_strided_slice %24 {offsets = [0, 19], sizes = [8, 512], strides = [1, 1]} : vector<8x768xbf16> to vector<8x512xbf16>
    %c2 = arith.constant 2 : index
    %c0_19 = arith.constant 0 : index
    %c0_20 = arith.constant 0 : index
    %37 = vector.load %arg2[%c2, %c0_19, %c0_20] : memref<27x8x8xbf16, #tpu.memory_space<vmem>>, vector<1x8x8xbf16>
    %38 = vector.shape_cast %37 : vector<1x8x8xbf16> to vector<8x8xbf16>
    %cst_21 = arith.constant dense<0.000000e+00> : vector<8x512xf32>
    %39 = tpu.matmul %38, %36, %cst_21 {dimension_numbers = #tpu.dot_dimension_numbers<[1], [0], [0], [1], [0, 0, 1, 1], [], []>} : vector<8x8xbf16>, vector<8x512xbf16>, vector<8x512xf32> -> vector<8x512xf32>
    %40 = arith.addf %35, %39 : vector<8x512xf32>
    %41 = vector.extract_strided_slice %24 {offsets = [0, 27], sizes = [8, 512], strides = [1, 1]} : vector<8x768xbf16> to vector<8x512xbf16>
    %c3 = arith.constant 3 : index
    %c0_22 = arith.constant 0 : index
    %c0_23 = arith.constant 0 : index
    %42 = vector.load %arg2[%c3, %c0_22, %c0_23] : memref<27x8x8xbf16, #tpu.memory_space<vmem>>, vector<1x8x8xbf16>
    %43 = vector.shape_cast %42 : vector<1x8x8xbf16> to vector<8x8xbf16>
    %cst_24 = arith.constant dense<0.000000e+00> : vector<8x512xf32>
    %44 = tpu.matmul %43, %41, %cst_24 {dimension_numbers = #tpu.dot_dimension_numbers<[1], [0], [0], [1], [0, 0, 1, 1], [], []>} : vector<8x8xbf16>, vector<8x512xbf16>, vector<8x512xf32> -> vector<8x512xf32>
    %45 = arith.addf %40, %44 : vector<8x512xf32>
    %46 = vector.extract_strided_slice %24 {offsets = [0, 28], sizes = [8, 512], strides = [1, 1]} : vector<8x768xbf16> to vector<8x512xbf16>
    %c4 = arith.constant 4 : index
    %c0_25 = arith.constant 0 : index
    %c0_26 = arith.constant 0 : index
    %47 = vector.load %arg2[%c4, %c0_25, %c0_26] : memref<27x8x8xbf16, #tpu.memory_space<vmem>>, vector<1x8x8xbf16>
    %48 = vector.shape_cast %47 : vector<1x8x8xbf16> to vector<8x8xbf16>
    %cst_27 = arith.constant dense<0.000000e+00> : vector<8x512xf32>
    %49 = tpu.matmul %48, %46, %cst_27 {dimension_numbers = #tpu.dot_dimension_numbers<[1], [0], [0], [1], [0, 0, 1, 1], [], []>} : vector<8x8xbf16>, vector<8x512xbf16>, vector<8x512xf32> -> vector<8x512xf32>
    %50 = arith.addf %45, %49 : vector<8x512xf32>
    %51 = vector.extract_strided_slice %24 {offsets = [0, 29], sizes = [8, 512], strides = [1, 1]} : vector<8x768xbf16> to vector<8x512xbf16>
    %c5 = arith.constant 5 : index
    %c0_28 = arith.constant 0 : index
    %c0_29 = arith.constant 0 : index
    %52 = vector.load %arg2[%c5, %c0_28, %c0_29] : memref<27x8x8xbf16, #tpu.memory_space<vmem>>, vector<1x8x8xbf16>
    %53 = vector.shape_cast %52 : vector<1x8x8xbf16> to vector<8x8xbf16>
    %cst_30 = arith.constant dense<0.000000e+00> : vector<8x512xf32>
    %54 = tpu.matmul %53, %51, %cst_30 {dimension_numbers = #tpu.dot_dimension_numbers<[1], [0], [0], [1], [0, 0, 1, 1], [], []>} : vector<8x8xbf16>, vector<8x512xbf16>, vector<8x512xf32> -> vector<8x512xf32>
    %55 = arith.addf %50, %54 : vector<8x512xf32>
    %56 = vector.extract_strided_slice %24 {offsets = [0, 37], sizes = [8, 512], strides = [1, 1]} : vector<8x768xbf16> to vector<8x512xbf16>
    %c6 = arith.constant 6 : index
    %c0_31 = arith.constant 0 : index
    %c0_32 = arith.constant 0 : index
    %57 = vector.load %arg2[%c6, %c0_31, %c0_32] : memref<27x8x8xbf16, #tpu.memory_space<vmem>>, vector<1x8x8xbf16>
    %58 = vector.shape_cast %57 : vector<1x8x8xbf16> to vector<8x8xbf16>
    %cst_33 = arith.constant dense<0.000000e+00> : vector<8x512xf32>
    %59 = tpu.matmul %58, %56, %cst_33 {dimension_numbers = #tpu.dot_dimension_numbers<[1], [0], [0], [1], [0, 0, 1, 1], [], []>} : vector<8x8xbf16>, vector<8x512xbf16>, vector<8x512xf32> -> vector<8x512xf32>
    %60 = arith.addf %55, %59 : vector<8x512xf32>
    %61 = vector.extract_strided_slice %24 {offsets = [0, 38], sizes = [8, 512], strides = [1, 1]} : vector<8x768xbf16> to vector<8x512xbf16>
    %c7 = arith.constant 7 : index
    %c0_34 = arith.constant 0 : index
    %c0_35 = arith.constant 0 : index
    %62 = vector.load %arg2[%c7, %c0_34, %c0_35] : memref<27x8x8xbf16, #tpu.memory_space<vmem>>, vector<1x8x8xbf16>
    %63 = vector.shape_cast %62 : vector<1x8x8xbf16> to vector<8x8xbf16>
    %cst_36 = arith.constant dense<0.000000e+00> : vector<8x512xf32>
    %64 = tpu.matmul %63, %61, %cst_36 {dimension_numbers = #tpu.dot_dimension_numbers<[1], [0], [0], [1], [0, 0, 1, 1], [], []>} : vector<8x8xbf16>, vector<8x512xbf16>, vector<8x512xf32> -> vector<8x512xf32>
    %65 = arith.addf %60, %64 : vector<8x512xf32>
    %66 = vector.extract_strided_slice %24 {offsets = [0, 39], sizes = [8, 512], strides = [1, 1]} : vector<8x768xbf16> to vector<8x512xbf16>
    %c8 = arith.constant 8 : index
    %c0_37 = arith.constant 0 : index
    %c0_38 = arith.constant 0 : index
    %67 = vector.load %arg2[%c8, %c0_37, %c0_38] : memref<27x8x8xbf16, #tpu.memory_space<vmem>>, vector<1x8x8xbf16>
    %68 = vector.shape_cast %67 : vector<1x8x8xbf16> to vector<8x8xbf16>
    %cst_39 = arith.constant dense<0.000000e+00> : vector<8x512xf32>
    %69 = tpu.matmul %68, %66, %cst_39 {dimension_numbers = #tpu.dot_dimension_numbers<[1], [0], [0], [1], [0, 0, 1, 1], [], []>} : vector<8x8xbf16>, vector<8x512xbf16>, vector<8x512xf32> -> vector<8x512xf32>
    %70 = arith.addf %65, %69 : vector<8x512xf32>
    %71 = vector.extract_strided_slice %24 {offsets = [0, 117], sizes = [8, 512], strides = [1, 1]} : vector<8x768xbf16> to vector<8x512xbf16>
    %c9 = arith.constant 9 : index
    %c0_40 = arith.constant 0 : index
    %c0_41 = arith.constant 0 : index
    %72 = vector.load %arg2[%c9, %c0_40, %c0_41] : memref<27x8x8xbf16, #tpu.memory_space<vmem>>, vector<1x8x8xbf16>
    %73 = vector.shape_cast %72 : vector<1x8x8xbf16> to vector<8x8xbf16>
    %cst_42 = arith.constant dense<0.000000e+00> : vector<8x512xf32>
    %74 = tpu.matmul %73, %71, %cst_42 {dimension_numbers = #tpu.dot_dimension_numbers<[1], [0], [0], [1], [0, 0, 1, 1], [], []>} : vector<8x8xbf16>, vector<8x512xbf16>, vector<8x512xf32> -> vector<8x512xf32>
    %75 = arith.addf %70, %74 : vector<8x512xf32>
    %76 = vector.extract_strided_slice %24 {offsets = [0, 118], sizes = [8, 512], strides = [1, 1]} : vector<8x768xbf16> to vector<8x512xbf16>
    %c10 = arith.constant 10 : index
    %c0_43 = arith.constant 0 : index
    %c0_44 = arith.constant 0 : index
    %77 = vector.load %arg2[%c10, %c0_43, %c0_44] : memref<27x8x8xbf16, #tpu.memory_space<vmem>>, vector<1x8x8xbf16>
    %78 = vector.shape_cast %77 : vector<1x8x8xbf16> to vector<8x8xbf16>
    %cst_45 = arith.constant dense<0.000000e+00> : vector<8x512xf32>
    %79 = tpu.matmul %78, %76, %cst_45 {dimension_numbers = #tpu.dot_dimension_numbers<[1], [0], [0], [1], [0, 0, 1, 1], [], []>} : vector<8x8xbf16>, vector<8x512xbf16>, vector<8x512xf32> -> vector<8x512xf32>
    %80 = arith.addf %75, %79 : vector<8x512xf32>
    %81 = vector.extract_strided_slice %24 {offsets = [0, 119], sizes = [8, 512], strides = [1, 1]} : vector<8x768xbf16> to vector<8x512xbf16>
    %c11 = arith.constant 11 : index
    %c0_46 = arith.constant 0 : index
    %c0_47 = arith.constant 0 : index
    %82 = vector.load %arg2[%c11, %c0_46, %c0_47] : memref<27x8x8xbf16, #tpu.memory_space<vmem>>, vector<1x8x8xbf16>
    %83 = vector.shape_cast %82 : vector<1x8x8xbf16> to vector<8x8xbf16>
    %cst_48 = arith.constant dense<0.000000e+00> : vector<8x512xf32>
    %84 = tpu.matmul %83, %81, %cst_48 {dimension_numbers = #tpu.dot_dimension_numbers<[1], [0], [0], [1], [0, 0, 1, 1], [], []>} : vector<8x8xbf16>, vector<8x512xbf16>, vector<8x512xf32> -> vector<8x512xf32>
    %85 = arith.addf %80, %84 : vector<8x512xf32>
    %86 = vector.extract_strided_slice %24 {offsets = [0, 127], sizes = [8, 512], strides = [1, 1]} : vector<8x768xbf16> to vector<8x512xbf16>
    %c12 = arith.constant 12 : index
    %c0_49 = arith.constant 0 : index
    %c0_50 = arith.constant 0 : index
    %87 = vector.load %arg2[%c12, %c0_49, %c0_50] : memref<27x8x8xbf16, #tpu.memory_space<vmem>>, vector<1x8x8xbf16>
    %88 = vector.shape_cast %87 : vector<1x8x8xbf16> to vector<8x8xbf16>
    %cst_51 = arith.constant dense<0.000000e+00> : vector<8x512xf32>
    %89 = tpu.matmul %88, %86, %cst_51 {dimension_numbers = #tpu.dot_dimension_numbers<[1], [0], [0], [1], [0, 0, 1, 1], [], []>} : vector<8x8xbf16>, vector<8x512xbf16>, vector<8x512xf32> -> vector<8x512xf32>
    %90 = arith.addf %85, %89 : vector<8x512xf32>
    %91 = vector.extract_strided_slice %24 {offsets = [0, 128], sizes = [8, 512], strides = [1, 1]} : vector<8x768xbf16> to vector<8x512xbf16>
    %c13 = arith.constant 13 : index
    %c0_52 = arith.constant 0 : index
    %c0_53 = arith.constant 0 : index
    %92 = vector.load %arg2[%c13, %c0_52, %c0_53] : memref<27x8x8xbf16, #tpu.memory_space<vmem>>, vector<1x8x8xbf16>
    %93 = vector.shape_cast %92 : vector<1x8x8xbf16> to vector<8x8xbf16>
    %cst_54 = arith.constant dense<0.000000e+00> : vector<8x512xf32>
    %94 = tpu.matmul %93, %91, %cst_54 {dimension_numbers = #tpu.dot_dimension_numbers<[1], [0], [0], [1], [0, 0, 1, 1], [], []>} : vector<8x8xbf16>, vector<8x512xbf16>, vector<8x512xf32> -> vector<8x512xf32>
    %95 = arith.addf %90, %94 : vector<8x512xf32>
    %96 = vector.extract_strided_slice %24 {offsets = [0, 129], sizes = [8, 512], strides = [1, 1]} : vector<8x768xbf16> to vector<8x512xbf16>
    %c14 = arith.constant 14 : index
    %c0_55 = arith.constant 0 : index
    %c0_56 = arith.constant 0 : index
    %97 = vector.load %arg2[%c14, %c0_55, %c0_56] : memref<27x8x8xbf16, #tpu.memory_space<vmem>>, vector<1x8x8xbf16>
    %98 = vector.shape_cast %97 : vector<1x8x8xbf16> to vector<8x8xbf16>
    %cst_57 = arith.constant dense<0.000000e+00> : vector<8x512xf32>
    %99 = tpu.matmul %98, %96, %cst_57 {dimension_numbers = #tpu.dot_dimension_numbers<[1], [0], [0], [1], [0, 0, 1, 1], [], []>} : vector<8x8xbf16>, vector<8x512xbf16>, vector<8x512xf32> -> vector<8x512xf32>
    %100 = arith.addf %95, %99 : vector<8x512xf32>
    %101 = vector.extract_strided_slice %24 {offsets = [0, 137], sizes = [8, 512], strides = [1, 1]} : vector<8x768xbf16> to vector<8x512xbf16>
    %c15 = arith.constant 15 : index
    %c0_58 = arith.constant 0 : index
    %c0_59 = arith.constant 0 : index
    %102 = vector.load %arg2[%c15, %c0_58, %c0_59] : memref<27x8x8xbf16, #tpu.memory_space<vmem>>, vector<1x8x8xbf16>
    %103 = vector.shape_cast %102 : vector<1x8x8xbf16> to vector<8x8xbf16>
    %cst_60 = arith.constant dense<0.000000e+00> : vector<8x512xf32>
    %104 = tpu.matmul %103, %101, %cst_60 {dimension_numbers = #tpu.dot_dimension_numbers<[1], [0], [0], [1], [0, 0, 1, 1], [], []>} : vector<8x8xbf16>, vector<8x512xbf16>, vector<8x512xf32> -> vector<8x512xf32>
    %105 = arith.addf %100, %104 : vector<8x512xf32>
    %106 = vector.extract_strided_slice %24 {offsets = [0, 138], sizes = [8, 512], strides = [1, 1]} : vector<8x768xbf16> to vector<8x512xbf16>
    %c16 = arith.constant 16 : index
    %c0_61 = arith.constant 0 : index
    %c0_62 = arith.constant 0 : index
    %107 = vector.load %arg2[%c16, %c0_61, %c0_62] : memref<27x8x8xbf16, #tpu.memory_space<vmem>>, vector<1x8x8xbf16>
    %108 = vector.shape_cast %107 : vector<1x8x8xbf16> to vector<8x8xbf16>
    %cst_63 = arith.constant dense<0.000000e+00> : vector<8x512xf32>
    %109 = tpu.matmul %108, %106, %cst_63 {dimension_numbers = #tpu.dot_dimension_numbers<[1], [0], [0], [1], [0, 0, 1, 1], [], []>} : vector<8x8xbf16>, vector<8x512xbf16>, vector<8x512xf32> -> vector<8x512xf32>
    %110 = arith.addf %105, %109 : vector<8x512xf32>
    %111 = vector.extract_strided_slice %24 {offsets = [0, 139], sizes = [8, 512], strides = [1, 1]} : vector<8x768xbf16> to vector<8x512xbf16>
    %c17 = arith.constant 17 : index
    %c0_64 = arith.constant 0 : index
    %c0_65 = arith.constant 0 : index
    %112 = vector.load %arg2[%c17, %c0_64, %c0_65] : memref<27x8x8xbf16, #tpu.memory_space<vmem>>, vector<1x8x8xbf16>
    %113 = vector.shape_cast %112 : vector<1x8x8xbf16> to vector<8x8xbf16>
    %cst_66 = arith.constant dense<0.000000e+00> : vector<8x512xf32>
    %114 = tpu.matmul %113, %111, %cst_66 {dimension_numbers = #tpu.dot_dimension_numbers<[1], [0], [0], [1], [0, 0, 1, 1], [], []>} : vector<8x8xbf16>, vector<8x512xbf16>, vector<8x512xf32> -> vector<8x512xf32>
    %115 = arith.addf %110, %114 : vector<8x512xf32>
    %116 = vector.extract_strided_slice %24 {offsets = [0, 217], sizes = [8, 512], strides = [1, 1]} : vector<8x768xbf16> to vector<8x512xbf16>
    %c18 = arith.constant 18 : index
    %c0_67 = arith.constant 0 : index
    %c0_68 = arith.constant 0 : index
    %117 = vector.load %arg2[%c18, %c0_67, %c0_68] : memref<27x8x8xbf16, #tpu.memory_space<vmem>>, vector<1x8x8xbf16>
    %118 = vector.shape_cast %117 : vector<1x8x8xbf16> to vector<8x8xbf16>
    %cst_69 = arith.constant dense<0.000000e+00> : vector<8x512xf32>
    %119 = tpu.matmul %118, %116, %cst_69 {dimension_numbers = #tpu.dot_dimension_numbers<[1], [0], [0], [1], [0, 0, 1, 1], [], []>} : vector<8x8xbf16>, vector<8x512xbf16>, vector<8x512xf32> -> vector<8x512xf32>
    %120 = arith.addf %115, %119 : vector<8x512xf32>
    %121 = vector.extract_strided_slice %24 {offsets = [0, 218], sizes = [8, 512], strides = [1, 1]} : vector<8x768xbf16> to vector<8x512xbf16>
    %c19 = arith.constant 19 : index
    %c0_70 = arith.constant 0 : index
    %c0_71 = arith.constant 0 : index
    %122 = vector.load %arg2[%c19, %c0_70, %c0_71] : memref<27x8x8xbf16, #tpu.memory_space<vmem>>, vector<1x8x8xbf16>
    %123 = vector.shape_cast %122 : vector<1x8x8xbf16> to vector<8x8xbf16>
    %cst_72 = arith.constant dense<0.000000e+00> : vector<8x512xf32>
    %124 = tpu.matmul %123, %121, %cst_72 {dimension_numbers = #tpu.dot_dimension_numbers<[1], [0], [0], [1], [0, 0, 1, 1], [], []>} : vector<8x8xbf16>, vector<8x512xbf16>, vector<8x512xf32> -> vector<8x512xf32>
    %125 = arith.addf %120, %124 : vector<8x512xf32>
    %126 = vector.extract_strided_slice %24 {offsets = [0, 219], sizes = [8, 512], strides = [1, 1]} : vector<8x768xbf16> to vector<8x512xbf16>
    %c20 = arith.constant 20 : index
    %c0_73 = arith.constant 0 : index
    %c0_74 = arith.constant 0 : index
    %127 = vector.load %arg2[%c20, %c0_73, %c0_74] : memref<27x8x8xbf16, #tpu.memory_space<vmem>>, vector<1x8x8xbf16>
    %128 = vector.shape_cast %127 : vector<1x8x8xbf16> to vector<8x8xbf16>
    %cst_75 = arith.constant dense<0.000000e+00> : vector<8x512xf32>
    %129 = tpu.matmul %128, %126, %cst_75 {dimension_numbers = #tpu.dot_dimension_numbers<[1], [0], [0], [1], [0, 0, 1, 1], [], []>} : vector<8x8xbf16>, vector<8x512xbf16>, vector<8x512xf32> -> vector<8x512xf32>
    %130 = arith.addf %125, %129 : vector<8x512xf32>
    %131 = vector.extract_strided_slice %24 {offsets = [0, 227], sizes = [8, 512], strides = [1, 1]} : vector<8x768xbf16> to vector<8x512xbf16>
    %c21 = arith.constant 21 : index
    %c0_76 = arith.constant 0 : index
    %c0_77 = arith.constant 0 : index
    %132 = vector.load %arg2[%c21, %c0_76, %c0_77] : memref<27x8x8xbf16, #tpu.memory_space<vmem>>, vector<1x8x8xbf16>
    %133 = vector.shape_cast %132 : vector<1x8x8xbf16> to vector<8x8xbf16>
    %cst_78 = arith.constant dense<0.000000e+00> : vector<8x512xf32>
    %134 = tpu.matmul %133, %131, %cst_78 {dimension_numbers = #tpu.dot_dimension_numbers<[1], [0], [0], [1], [0, 0, 1, 1], [], []>} : vector<8x8xbf16>, vector<8x512xbf16>, vector<8x512xf32> -> vector<8x512xf32>
    %135 = arith.addf %130, %134 : vector<8x512xf32>
    %136 = vector.extract_strided_slice %24 {offsets = [0, 228], sizes = [8, 512], strides = [1, 1]} : vector<8x768xbf16> to vector<8x512xbf16>
    %c22 = arith.constant 22 : index
    %c0_79 = arith.constant 0 : index
    %c0_80 = arith.constant 0 : index
    %137 = vector.load %arg2[%c22, %c0_79, %c0_80] : memref<27x8x8xbf16, #tpu.memory_space<vmem>>, vector<1x8x8xbf16>
    %138 = vector.shape_cast %137 : vector<1x8x8xbf16> to vector<8x8xbf16>
    %cst_81 = arith.constant dense<0.000000e+00> : vector<8x512xf32>
    %139 = tpu.matmul %138, %136, %cst_81 {dimension_numbers = #tpu.dot_dimension_numbers<[1], [0], [0], [1], [0, 0, 1, 1], [], []>} : vector<8x8xbf16>, vector<8x512xbf16>, vector<8x512xf32> -> vector<8x512xf32>
    %140 = arith.addf %135, %139 : vector<8x512xf32>
    %141 = vector.extract_strided_slice %24 {offsets = [0, 229], sizes = [8, 512], strides = [1, 1]} : vector<8x768xbf16> to vector<8x512xbf16>
    %c23 = arith.constant 23 : index
    %c0_82 = arith.constant 0 : index
    %c0_83 = arith.constant 0 : index
    %142 = vector.load %arg2[%c23, %c0_82, %c0_83] : memref<27x8x8xbf16, #tpu.memory_space<vmem>>, vector<1x8x8xbf16>
    %143 = vector.shape_cast %142 : vector<1x8x8xbf16> to vector<8x8xbf16>
    %cst_84 = arith.constant dense<0.000000e+00> : vector<8x512xf32>
    %144 = tpu.matmul %143, %141, %cst_84 {dimension_numbers = #tpu.dot_dimension_numbers<[1], [0], [0], [1], [0, 0, 1, 1], [], []>} : vector<8x8xbf16>, vector<8x512xbf16>, vector<8x512xf32> -> vector<8x512xf32>
    %145 = arith.addf %140, %144 : vector<8x512xf32>
    %146 = vector.extract_strided_slice %24 {offsets = [0, 237], sizes = [8, 512], strides = [1, 1]} : vector<8x768xbf16> to vector<8x512xbf16>
    %c24 = arith.constant 24 : index
    %c0_85 = arith.constant 0 : index
    %c0_86 = arith.constant 0 : index
    %147 = vector.load %arg2[%c24, %c0_85, %c0_86] : memref<27x8x8xbf16, #tpu.memory_space<vmem>>, vector<1x8x8xbf16>
    %148 = vector.shape_cast %147 : vector<1x8x8xbf16> to vector<8x8xbf16>
    %cst_87 = arith.constant dense<0.000000e+00> : vector<8x512xf32>
    %149 = tpu.matmul %148, %146, %cst_87 {dimension_numbers = #tpu.dot_dimension_numbers<[1], [0], [0], [1], [0, 0, 1, 1], [], []>} : vector<8x8xbf16>, vector<8x512xbf16>, vector<8x512xf32> -> vector<8x512xf32>
    %150 = arith.addf %145, %149 : vector<8x512xf32>
    %151 = vector.extract_strided_slice %24 {offsets = [0, 238], sizes = [8, 512], strides = [1, 1]} : vector<8x768xbf16> to vector<8x512xbf16>
    %c25 = arith.constant 25 : index
    %c0_88 = arith.constant 0 : index
    %c0_89 = arith.constant 0 : index
    %152 = vector.load %arg2[%c25, %c0_88, %c0_89] : memref<27x8x8xbf16, #tpu.memory_space<vmem>>, vector<1x8x8xbf16>
    %153 = vector.shape_cast %152 : vector<1x8x8xbf16> to vector<8x8xbf16>
    %cst_90 = arith.constant dense<0.000000e+00> : vector<8x512xf32>
    %154 = tpu.matmul %153, %151, %cst_90 {dimension_numbers = #tpu.dot_dimension_numbers<[1], [0], [0], [1], [0, 0, 1, 1], [], []>} : vector<8x8xbf16>, vector<8x512xbf16>, vector<8x512xf32> -> vector<8x512xf32>
    %155 = arith.addf %150, %154 : vector<8x512xf32>
    %156 = vector.extract_strided_slice %24 {offsets = [0, 239], sizes = [8, 512], strides = [1, 1]} : vector<8x768xbf16> to vector<8x512xbf16>
    %c26 = arith.constant 26 : index
    %c0_91 = arith.constant 0 : index
    %c0_92 = arith.constant 0 : index
    %157 = vector.load %arg2[%c26, %c0_91, %c0_92] : memref<27x8x8xbf16, #tpu.memory_space<vmem>>, vector<1x8x8xbf16>
    %158 = vector.shape_cast %157 : vector<1x8x8xbf16> to vector<8x8xbf16>
    %cst_93 = arith.constant dense<0.000000e+00> : vector<8x512xf32>
    %159 = tpu.matmul %158, %156, %cst_93 {dimension_numbers = #tpu.dot_dimension_numbers<[1], [0], [0], [1], [0, 0, 1, 1], [], []>} : vector<8x8xbf16>, vector<8x512xbf16>, vector<8x512xf32> -> vector<8x512xf32>
    %160 = arith.addf %155, %159 : vector<8x512xf32>
    %c0_94 = arith.constant 0 : index
    %c0_95 = arith.constant 0 : index
    %161 = vector.load %arg3[%c0_94, %c0_95] : memref<8x1xf32, #tpu.memory_space<vmem>>, vector<8x1xf32>
    %162 = vector.broadcast %161 : vector<8x1xf32> to vector<8x512xf32>
    %163 = arith.addf %160, %162 : vector<8x512xf32>
    %cst_96 = arith.constant 0.000000e+00 : f32
    %164 = vector.broadcast %cst_96 : f32 to vector<8x512xf32>
    %165 = arith.maximumf %163, %164 : vector<8x512xf32>
    %c0_97 = arith.constant 0 : index
    %c0_98 = arith.constant 0 : index
    %166 = vector.load %arg4[%c0_97, %c0_98] : memref<8x512xf32, #tpu.memory_space<vmem>>, vector<8x512xf32>
    tpu.vector_store %arg4[%c0_97, %c0_98], %165 {strides = array<i32>} : memref<8x512xf32, #tpu.memory_space<vmem>>, vector<8x512xf32>,
    return
  }
  func.func @transform_1(%arg0: i32) -> (i32, i32, i32) {
    %c0_i32 = arith.constant 0 : i32
    %c0_i32_0 = arith.constant 0 : i32
    %c0_i32_1 = arith.constant 0 : i32
    %c0_i32_2 = arith.constant 0 : i32
    return %c0_i32, %c0_i32_0, %c0_i32_1 : i32, i32, i32
  }
  func.func @transform_2(%arg0: i32) -> (i32, i32) {
    %c0_i32 = arith.constant 0 : i32
    %c0_i32_0 = arith.constant 0 : i32
    %c0_i32_1 = arith.constant 0 : i32
    return %c0_i32, %c0_i32_0 : i32, i32
  }
  func.func @transform_3(%arg0: i32) -> (i32, i32) {
    %c0_i32 = arith.constant 0 : i32
    %c0_i32_0 = arith.constant 0 : i32
    return %c0_i32, %arg0 : i32, i32
  }
}

</mosaic_0001>

<bundles_post_ra>
// kernel: make_dense_forward.1
= control target key start
LH: loop header
LB: loop body
LE: loop exit
PB: predicated region body
PF: predicated region fallthrough
CT: control target
= control target key end

     0   :  { %s3803_s12 = smov 0   ;;  %s4418_s0 = inlined_call_operand.vmem [shape: bf16[8,2304], index: 0, kind: input, shape index: {}]   ;;  %s4419_s1 = inlined_call_operand.vmem [shape: bf16[27,8,8], index: 1, kind: input, shape index: {}]   ;;  %s4420_s2 = inlined_call_operand.vmem [shape: f32[8,1], index: 2, kind: input, shape index: {}]   ;;  %s4421_s3 = inlined_call_operand.vmem [shape: f32[8,2048], index: 3, kind: output, shape index: {}]  }
   0x1 LB: > { %s3809_s13 = sadd.s32 4294967295, %s3754_s12   ;;  %p3544_p0 = scmp.ge.s32.totalorder %s3754_s12, 1  ;;  %s3754_s12 = sphi %s3803_s12, %s13_s12  }
   0x2   : > { %p103_p1 = scmp.lt.s32.totalorder %s3754_s12, 5 }
   0x4   : > { %p104_p2 = pnand %p3544_p0, %p103_p1 }
   0x5   : > { %s3545_s14 = sshll.u32 (!%p104_p2), %s3809_s13, 2  ;;  %p3547_p4 = scmp.ne.s32.totalorder (!%p104_p2), %s3809_s13, 0 }
   0x6   : > { %107 = sbr.rel (%p104_p2) target bundleno = 630 (0x276), region = 28  ;;  %p121_p3 = scmp.lt.s32.totalorder (!%p104_p2), %s3545_s14, 15 }
   0xb   : > { %s4423_s14 = smov (!%p121_p3, %s3545_s14), 15  ;;  %130 = sbr.rel (%p3547_p4) target bundleno = 20 (0x14), region = 32 }
   0xc   : > { %s3546_s15 = sshll.u32 %s4423_s14, 3 }
   0xd   : > { %s3817_s18 = scalar_lea.vmem %s4421_s3, %s3546_s15 }
  0x10   : > { %v164_v0 = vld [vmem:[%s4418_s0] sm:$0xff]  ;;  %v166_v1 = vld [vmem:[%s4418_s0 + $0x8] sm:$0xff]  ;;  %v168_v2 = vld [vmem:[%s4418_s0 + $0x10] sm:$0xff] }
  0x11   : > { %165 = vst [vmem:[#allocation2] sm:$0xff] %v164_v0  ;;  %167 = vst [vmem:[#allocation2 + $0x8] sm:$0xff] %v166_v1 }
  0x12   : > { %169 = vst [vmem:[#allocation2 + $0x10] sm:$0xff] %v168_v2 }
  0x13   : > { %177 = vsyncadd [#allocation3], 384 }
  0x14 PF: > { %p178_p5 = scmp.lt.s32.totalorder %s3809_s13, 0  ;;  %s179_s25 = ssub.s32 0, %s3809_s13 }
  0x15   : > { %s3548_s26 = smin.u32 %s3809_s13, %s179_s25 }
  0x16   : > { %s181_s27 = sand.u32 1, %s3548_s26  }
  0x17   : > { %s182_s28 = ssub.s32 0, %s181_s27 }
  0x18   : > { %s4425_s28 = smov (!%p178_p5, %s182_s28), %s181_s27 }
  0x19   : > { %p3550_p6 = scmp.lt.s32.totalorder %s4425_s28, 0  ;;  %s188_s29 = sadd.s32 2, %s4425_s28 }
  0x1b   : > { %s4427_s29 = smov (!%p3550_p6, %s188_s29), %s4425_s28 }
  0x1c   : > { %s3700_s30 = smul.u32 24, %s4427_s29  ;;  %s193_s5 = scalar_lea.sflag [#allocation3], %s4427_s29 }
  0x1e   : > { %s3832_s4 = scalar_lea.vmem [#allocation2], %s3700_s30 }
  0x1f   : > { %3750 = dma.done.wait %s193_s5, 384 }
  0x20   : > { %3751 = vsyncadd %s193_s5, 4294966912  ;;  %s198_s6 = sadd.s32 1, %s3809_s13 }
  0x21   : > { %p3552_p7 = scmp.ge.s32.totalorder %s198_s6, 4 }
  0x22   : > { %s203_s7 = ssub.s32 (!%p3552_p7), 1, %s4427_s29  ;;  %s3701_s8 = sshll.u32 (!%p3552_p7), %s3809_s13, 9 }
  0x23   : > { %202 = sbr.rel (%p3552_p7) target bundleno = 44 (0x2c), region = 70  ;;  %s3702_s9 = sadd.s32 (!%p3552_p7), 512, %s3701_s8 }
  0x24   : > { %s3703_s10 = smul.u32 (!%p3552_p7), 24, %s203_s7  ;;  %s205_s11 = sshra.s32 (!%p3552_p7), %s3702_s9, 7 }
  0x25   : > { %s3554_s14 = sshll.u32 (!%p3552_p7), %s205_s11, 2  ;;  %s212_s20 = scalar_lea.sflag (!%p3552_p7), [#allocation3], %s203_s7 }
  0x26   : > { %s208_s17 = scalar_lea.vmem (!%p3552_p7), %s4418_s0, %s3554_s14  ;;  %s211_s19 = scalar_lea.vmem (!%p3552_p7), [#allocation2], %s3703_s10 }
  0x28   : > { %v246_v3 = vld [vmem:[%s208_s17] sm:$0xff]  ;;  %v248_v4 = vld [vmem:[%s208_s17 + $0x8] sm:$0xff]  ;;  %v250_v5 = vld [vmem:[%s208_s17 + $0x10] sm:$0xff] }
  0x29   : > { %247 = vst [vmem:[%s211_s19] sm:$0xff] %v246_v3  ;;  %249 = vst [vmem:[%s211_s19 + $0x8] sm:$0xff] %v248_v4 }
  0x2a   : > { %251 = vst [vmem:[%s211_s19 + $0x10] sm:$0xff] %v250_v5 }
  0x2b   : > { %259 = vsyncadd %s212_s20, 384 }
  0x2c PF: > { %s3756_s13 = smov 110   ;;  %v3757_v13 = vmov 0   ;;  %s3758_s21 = smov 111   ;;  %vm289_vm0 = vcmask 900096   ;;  %vm298_vm1 = vcmask 1043456   ;;  %vm294_vm2 = vcmask 64512  }
  0x2d   : > { %343 = vmatprep.mubr.bf16.mxu0 %v3757_v13  ;;  %384 = vmatprep.mubr.bf16.mxu1 %v3757_v13  ;;  %s3759_s22 = smov 109   ;;  %s3760_s23 = smov 101   ;;  %v3556_v25 = vld [vmem:[%s4419_s1 + $0x4] sm:$0xf]  ;;  %vm403_vm3 = vcmask 908288   ;;  %vm517_vm4 = vcmask 891904  }
  0x2e   : > { %3739 = vset.pattern.permute.xlu0 %v3757_v13  ;;  %s3761_s24 = smov 100   ;;  %s3762_s25 = smov 99   ;;  %v263_v35 = vld [vmem:[%s4419_s1] sm:$0xf]  ;;  %v3570_v50 = vld [vmem:[%s4419_s1 + $0x8] sm:$0xf] }
  0x2f   : > { %s3763_s26 = smov 91   ;;  %s3764_s27 = smov 90   ;;  %vm635_vm5 = vcmask 826368   ;;  %v3575_v60 = vld [vmem:[%s4419_s1 + $0xc] sm:$0xf]  ;;  %vm753_vm6 = vcmask 818176  }
  0x30   : > { %s3765_s28 = smov 89   ;;  %s3766_s29 = smov 11   ;;  %vm871_vm7 = vcmask 809984   ;;  %vm989_vm8 = vcmask 744448   ;;  %vm1107_vm9 = vcmask 736256   ;;  %vm1225_vm10 = vcmask 728064  }
  0x31   : > { %v261_v6 = vld [vmem:[%s3832_s4 + $0x8] sm:$0xff]  ;;  %v260_v7 = vld [vmem:[%s3832_s4] sm:$0xff]  ;;  %v3852_v12 = vld [vmem:[%s3832_s4 + $0x10] sm:$0xff]  ;;  %s3767_s30 = smov 10   ;;  %s3768_s4 = smov 9   ;;  %vm1343_vm11 = vcmask 89088  }
  0x32   : > { %v3841_v8 = vcombine.low %v261_v6, %v261_v6  ;;  %v3843_v9 = vcombine.low %v260_v7, %v260_v7  ;;  %v3846_v10 = vcombine.high %v260_v7, %v260_v7  ;;  %v3849_v11 = vcombine.high %v261_v6, %v261_v6  ;;  %s3769_s5 = smov 1   ;;  %s3770_s8 = smov 127  }
  0x33   : > { %v3861_v14 = vcombine.low %v3852_v12, %v3852_v12  ;;  %v3954_v39 = vcombine.high %v3852_v12, %v3852_v12  ;;  %s3771_s11 = smov 119   ;;  %s3772_s16 = smov 118   ;;  %vm1461_vm12 = vcmask 80896   ;;  %vm1579_vm13 = vcmask 72704  }
  0x34   : > { %283 = vrot.lane.b32.xlu1 %v3841_v8, %s3756_s13  ;;  %279 = vrot.lane.b32.xlu0 %v3843_v9, %s3756_s13  ;;  %s3773_s20 = smov 117   ;;  %s3778_s7 = smov 28   ;;  %vm1697_vm14 = vcmask 7168   ;;  %vm1920_vm15 = vcmask 1039360  }
  0x35   : > { %s3779_s10 = smov 27   ;;  %s3780_s15 = smov 19  }
  0x36   : > { %s3781_s19 = smov 18  }
  0x38   : > { %285 = vrot.lane.b32.xlu1 %v3849_v11, %s3756_s13  ;;  %281 = vrot.lane.b32.xlu0 %v3846_v10, %s3756_s13 }
  0x3c   : > { %393 = vrot.lane.b32.xlu1 %v3843_v9, %s3758_s21  ;;  %287 = vrot.lane.b32.xlu0 %v3861_v14, %s3756_s13 }
  0x40   : > { %397 = vrot.lane.b32.xlu1 %v3841_v8, %s3758_s21  ;;  %395 = vrot.lane.b32.xlu0 %v3846_v10, %s3758_s21 }
  0x44   : > { %401 = vrot.lane.b32.xlu1 %v3861_v14, %s3758_s21  ;;  %399 = vrot.lane.b32.xlu0 %v3849_v11, %s3758_s21  ;;  %s3782_s21 = smov 17  }
  0x48   : > { %509 = vrot.lane.b32.xlu1 %v3846_v10, %s3759_s22  ;;  %507 = vrot.lane.b32.xlu0 %v3843_v9, %s3759_s22 }
  0x4c   : > { %513 = vrot.lane.b32.xlu1 %v3849_v11, %s3759_s22  ;;  %511 = vrot.lane.b32.xlu0 %v3841_v8, %s3759_s22 }
  0x50   : > { %625 = vrot.lane.b32.xlu1 %v3843_v9, %s3760_s23  ;;  %515 = vrot.lane.b32.xlu0 %v3861_v14, %s3759_s22  ;;  %s3774_s22 = smov 39  }
  0x54   : > { %629 = vrot.lane.b32.xlu1 %v3841_v8, %s3760_s23  ;;  %627 = vrot.lane.b32.xlu0 %v3846_v10, %s3760_s23 }
  0x58   : > { %633 = vrot.lane.b32.xlu1 %v3861_v14, %s3760_s23  ;;  %631 = vrot.lane.b32.xlu0 %v3849_v11, %s3760_s23 }
  0x5c   : > { %745 = vrot.lane.b32.xlu1 %v3846_v10, %s3761_s24  ;;  %743 = vrot.lane.b32.xlu0 %v3843_v9, %s3761_s24 }
  0x60   : > { %749 = vrot.lane.b32.xlu1 %v3849_v11, %s3761_s24  ;;  %747 = vrot.lane.b32.xlu0 %v3841_v8, %s3761_s24 }
  0x64   : > { %861 = vrot.lane.b32.xlu1 %v3843_v9, %s3762_s25  ;;  %751 = vrot.lane.b32.xlu0 %v3861_v14, %s3761_s24 }
  0x68   : > { %865 = vrot.lane.b32.xlu1 %v3841_v8, %s3762_s25  ;;  %863 = vrot.lane.b32.xlu0 %v3846_v10, %s3762_s25 }
  0x6c   : > { %869 = vrot.lane.b32.xlu1 %v3861_v14, %s3762_s25  ;;  %867 = vrot.lane.b32.xlu0 %v3849_v11, %s3762_s25  ;;  %s3775_s25 = smov 38  }
  0x70   : > { %981 = vrot.lane.b32.xlu1 %v3846_v10, %s3763_s26  ;;  %979 = vrot.lane.b32.xlu0 %v3843_v9, %s3763_s26 }
  0x74   : > { %985 = vrot.lane.b32.xlu1 %v3849_v11, %s3763_s26  ;;  %983 = vrot.lane.b32.xlu0 %v3841_v8, %s3763_s26 }
  0x78   : > { %1097 = vrot.lane.b32.xlu1 %v3843_v9, %s3764_s27  ;;  %987 = vrot.lane.b32.xlu0 %v3861_v14, %s3763_s26 }
  0x7c   : > { %1101 = vrot.lane.b32.xlu1 %v3841_v8, %s3764_s27  ;;  %1099 = vrot.lane.b32.xlu0 %v3846_v10, %s3764_s27 }
  0x80   : > { %1105 = vrot.lane.b32.xlu1 %v3861_v14, %s3764_s27  ;;  %1103 = vrot.lane.b32.xlu0 %v3849_v11, %s3764_s27 }
  0x84   : > { %1217 = vrot.lane.b32.xlu1 %v3846_v10, %s3765_s28  ;;  %1215 = vrot.lane.b32.xlu0 %v3843_v9, %s3765_s28 }
  0x88   : > { %1221 = vrot.lane.b32.xlu1 %v3849_v11, %s3765_s28  ;;  %1219 = vrot.lane.b32.xlu0 %v3841_v8, %s3765_s28 }
  0x8c   : > { %1333 = vrot.lane.b32.xlu1 %v3843_v9, %s3766_s29  ;;  %1223 = vrot.lane.b32.xlu0 %v3861_v14, %s3765_s28  ;;  %s3776_s28 = smov 37  }
  0x90   : > { %1337 = vrot.lane.b32.xlu1 %v3841_v8, %s3766_s29  ;;  %1335 = vrot.lane.b32.xlu0 %v3846_v10, %s3766_s29 }
  0x94   : > { %1341 = vrot.lane.b32.xlu1 %v3861_v14, %s3766_s29  ;;  %1339 = vrot.lane.b32.xlu0 %v3849_v11, %s3766_s29 }
  0x98   : > { %1453 = vrot.lane.b32.xlu1 %v3846_v10, %s3767_s30  ;;  %1451 = vrot.lane.b32.xlu0 %v3843_v9, %s3767_s30 }
  0x9c   : > { %1457 = vrot.lane.b32.xlu1 %v3849_v11, %s3767_s30  ;;  %1455 = vrot.lane.b32.xlu0 %v3841_v8, %s3767_s30 }
  0xa0   : > { %1569 = vrot.lane.b32.xlu1 %v3843_v9, %s3768_s4  ;;  %1459 = vrot.lane.b32.xlu0 %v3861_v14, %s3767_s30 }
  0xa4   : > { %1573 = vrot.lane.b32.xlu1 %v3841_v8, %s3768_s4  ;;  %1571 = vrot.lane.b32.xlu0 %v3846_v10, %s3768_s4 }
  0xa6   : > { %v284_v15 = vpop.permute.xlu1 %283  ;;  %v280_v16 = vpop.permute.xlu0 %279 }
  0xa8   : > { %1577 = vrot.lane.b32.xlu1 %v3861_v14, %s3768_s4  ;;  %1575 = vrot.lane.b32.xlu0 %v3849_v11, %s3768_s4  ;;  %s3777_s4 = smov 29  }
  0xaa   : > { %v286_v17 = vpop.permute.xlu1 %285  ;;  %v282_v18 = vpop.permute.xlu0 %281 }
  0xab   : > { %v291_v19 = vsel %vm289_vm0, %v282_v18, %v284_v15  ;;  %v290_v20 = vsel %vm289_vm0, %v280_v16, %v282_v18  ;;  %v292_v24 = vsel %vm289_vm0, %v284_v15, %v286_v17  ;;  %v3580_v15 = vld [vmem:[%s4419_s1 + $0x10] sm:$0xf] }
  0xac   : > { %1689 = vrot.lane.b32.xlu1 %v3846_v10, %s3769_s5  ;;  %1687 = vrot.lane.b32.xlu0 %v3843_v9, %s3769_s5  ;;  %v300_v21 = vsel %vm298_vm1, %v290_v20, 0  ;;  %v306_v27 = vsel %vm298_vm1, %v292_v24, 0 }
  0xad   : > { %3562 = vmatprep.subr.msk.bf16.mxu0 %vm298_vm1, %v291_v19 }
  0xae   : > { %326 = vmatpush1.bf16.msra.mxu0 %v300_v21  ;;  %v394_v22 = vpop.permute.xlu1 %393  ;;  %v288_v23 = vpop.permute.xlu0 %287 }
  0xaf   : > { %v293_v26 = vsel %vm289_vm0, %v286_v17, %v288_v23  ;;  %vm2038_vm0 = vcmask 973824  }
  0xb0   : > { %1693 = vrot.lane.b32.xlu1 %v3849_v11, %s3769_s5  ;;  %1691 = vrot.lane.b32.xlu0 %v3841_v8, %s3769_s5 }
  0xb1   : > { %3564 = vmatprep.subr.msk.bf16.mxu1 %vm298_vm1, %v293_v26  ;;  %3563 = vmatmul.mubr.msk.bf16.vlgmr.msra.gmra.mxu0 %vm294_vm2, %v3556_v25 }
  0xb2   : > { %367 = vmatpush1.bf16.msra.mxu1 %v306_v27  ;;  %v398_v28 = vpop.permute.xlu1 %397  ;;  %v396_v29 = vpop.permute.xlu0 %395  ;;  %455 = vmatprep.mubr.bf16.mxu0 %v3757_v13 }
  0xb3   : > { %v404_v30 = vsel %vm403_vm3, %v394_v22, %v396_v29  ;;  %v405_v31 = vsel %vm403_vm3, %v396_v29, %v398_v28 }
  0xb4   : > { %1910 = vrot.lane.b32.xlu1 %v3846_v10, %s3770_s8  ;;  %1695 = vrot.lane.b32.xlu0 %v3861_v14, %s3769_s5  ;;  %v412_v32 = vsel %vm298_vm1, %v404_v30, 0 }
  0xb5   : > { %3566 = vmatprep.subr.msk.bf16.mxu0 %vm298_vm1, %v405_v31  ;;  %3565 = vmatmul.mubr.msk.bf16.vlgmr.msra.gmra.mxu1 %vm294_vm2, %v3556_v25  ;;  %v3585_v25 = vld [vmem:[%s4419_s1 + $0x14] sm:$0xf] }
  0xb6   : > { %438 = vmatpush1.bf16.msra.mxu0 %v412_v32  ;;  %v402_v33 = vpop.permute.xlu1 %401  ;;  %v400_v34 = vpop.permute.xlu0 %399  ;;  %496 = vmatprep.mubr.bf16.mxu1 %v3757_v13 }
  0xb7   : > { %v406_v36 = vsel %vm403_vm3, %v398_v28, %v400_v34  ;;  %v407_v37 = vsel %vm403_vm3, %v400_v34, %v402_v33  ;;  %vm2156_vm3 = vcmask 965632  }
  0xb8   : > { %1914 = vrot.lane.b32.xlu1 %v3849_v11, %s3770_s8  ;;  %1912 = vrot.lane.b32.xlu0 %v3841_v8, %s3770_s8  ;;  %v418_v38 = vsel %vm298_vm1, %v406_v36, 0 }
  0xb9   : > { %3568 = vmatprep.subr.msk.bf16.mxu1 %vm298_vm1, %v407_v37  ;;  %3567 = vmatmul.mubr.msk.bf16.vlgmr.msra.gmra.mxu0 %vm294_vm2, %v263_v35 }
  0xba   : > { %479 = vmatpush1.bf16.msra.mxu1 %v418_v38  ;;  %v510_v40 = vpop.permute.xlu1 %509  ;;  %v508_v41 = vpop.permute.xlu0 %507  ;;  %569 = vmatprep.mubr.bf16.mxu0 %v3757_v13 }
  0xbb   : > { %v518_v42 = vsel %vm517_vm4, %v508_v41, %v510_v40 }
  0xbc   : > { %1918 = vrot.lane.b32.xlu1 %v3954_v39, %s3770_s8  ;;  %1916 = vrot.lane.b32.xlu0 %v3861_v14, %s3770_s8  ;;  %v526_v46 = vsel %vm298_vm1, %v518_v42, 0 }
  0xbd   : > { %3569 = vmatmul.mubr.msk.bf16.vlgmr.msra.gmra.mxu1 %vm294_vm2, %v263_v35 }
  0xbe   : > { %v514_v43 = vpop.permute.xlu1 %513  ;;  %v512_v44 = vpop.permute.xlu0 %511  ;;  %610 = vmatprep.mubr.bf16.mxu1 %v3757_v13 }
  0xbf   : > { %v519_v45 = vsel %vm517_vm4, %v510_v40, %v512_v44  ;;  %v520_v47 = vsel %vm517_vm4, %v512_v44, %v514_v43  ;;  %v3590_v40 = vld [vmem:[%s4419_s1 + $0x18] sm:$0xf] }
  0xc0   : > { %2030 = vrot.lane.b32.xlu1 %v3841_v8, %s3771_s11  ;;  %2028 = vrot.lane.b32.xlu0 %v3846_v10, %s3771_s11  ;;  %v532_v52 = vsel %vm298_vm1, %v520_v47, 0 }
  0xc1   : > { %3571 = vmatprep.subr.msk.bf16.mxu0 %vm298_vm1, %v519_v45 }
  0xc2   : > { %552 = vmatpush1.bf16.msra.mxu0 %v526_v46  ;;  %v626_v48 = vpop.permute.xlu1 %625  ;;  %v516_v49 = vpop.permute.xlu0 %515 }
  0xc3   : > { %v521_v51 = vsel %vm517_vm4, %v514_v43, %v516_v49  ;;  %vm2274_vm4 = vcmask 957440  }
  0xc4   : > { %2034 = vrot.lane.b32.xlu1 %v3861_v14, %s3771_s11  ;;  %2032 = vrot.lane.b32.xlu0 %v3849_v11, %s3771_s11 }
  0xc5   : > { %3573 = vmatprep.subr.msk.bf16.mxu1 %vm298_vm1, %v521_v51  ;;  %3572 = vmatmul.mubr.msk.bf16.vlgmr.msra.gmra.mxu0 %vm294_vm2, %v3570_v50 }
  0xc6   : > { %593 = vmatpush1.bf16.msra.mxu1 %v532_v52  ;;  %v630_v53 = vpop.permute.xlu1 %629  ;;  %v628_v54 = vpop.permute.xlu0 %627  ;;  %687 = vmatprep.mubr.bf16.mxu0 %v3757_v13 }
  0xc7   : > { %v636_v55 = vsel %vm635_vm5, %v626_v48, %v628_v54  ;;  %v637_v56 = vsel %vm635_vm5, %v628_v54, %v630_v53 }
  0xc8   : > { %2146 = vrot.lane.b32.xlu1 %v3846_v10, %s3772_s16  ;;  %2036 = vrot.lane.b32.xlu0 %v3954_v39, %s3771_s11  ;;  %v644_v57 = vsel %vm298_vm1, %v636_v55, 0 }
  0xc9   : > { %3576 = vmatprep.subr.msk.bf16.mxu0 %vm298_vm1, %v637_v56  ;;  %3574 = vmatmul.mubr.msk.bf16.vlgmr.msra.gmra.mxu1 %vm294_vm2, %v3570_v50  ;;  %v3595_v50 = vld [vmem:[%s4419_s1 + $0x1c] sm:$0xf] }
  0xca   : > { %670 = vmatpush1.bf16.msra.mxu0 %v644_v57  ;;  %v634_v58 = vpop.permute.xlu1 %633  ;;  %v632_v59 = vpop.permute.xlu0 %631  ;;  %728 = vmatprep.mubr.bf16.mxu1 %v3757_v13 }
  0xcb   : > { %v638_v61 = vsel %vm635_vm5, %v630_v53, %v632_v59  ;;  %v639_v62 = vsel %vm635_vm5, %v632_v59, %v634_v58  ;;  %vm2392_vm5 = vcmask 318464  }
  0xcc   : > { %2150 = vrot.lane.b32.xlu1 %v3849_v11, %s3772_s16  ;;  %2148 = vrot.lane.b32.xlu0 %v3841_v8, %s3772_s16  ;;  %v650_v63 = vsel %vm298_vm1, %v638_v61, 0 }
  0xcd   : > { %3578 = vmatprep.subr.msk.bf16.mxu1 %vm298_vm1, %v639_v62  ;;  %3577 = vmatmul.mubr.msk.bf16.vlgmr.msra.gmra.mxu0 %vm294_vm2, %v3575_v60 }
  0xce   : > { %711 = vmatpush1.bf16.msra.mxu1 %v650_v63  ;;  %v746_v0 = vpop.permute.xlu1 %745  ;;  %v744_v1 = vpop.permute.xlu0 %743  ;;  %805 = vmatprep.mubr.bf16.mxu0 %v3757_v13 }
  0xcf   : > { %v754_v2 = vsel %vm753_vm6, %v744_v1, %v746_v0 }
  0xd0   : > { %2154 = vrot.lane.b32.xlu1 %v3954_v39, %s3772_s16  ;;  %2152 = vrot.lane.b32.xlu0 %v3861_v14, %s3772_s16  ;;  %v762_v6 = vsel %vm298_vm1, %v754_v2, 0 }
  0xd1   : > { %3579 = vmatmul.mubr.msk.bf16.vlgmr.msra.gmra.mxu1 %vm294_vm2, %v3575_v60 }
  0xd2   : > { %v750_v3 = vpop.permute.xlu1 %749  ;;  %v748_v4 = vpop.permute.xlu0 %747  ;;  %846 = vmatprep.mubr.bf16.mxu1 %v3757_v13 }
  0xd3   : > { %v755_v5 = vsel %vm753_vm6, %v746_v0, %v748_v4  ;;  %v756_v7 = vsel %vm753_vm6, %v748_v4, %v750_v3  ;;  %v3600_v0 = vld [vmem:[%s4419_s1 + $0x20] sm:$0xf] }
  0xd4   : > { %2266 = vrot.lane.b32.xlu1 %v3841_v8, %s3773_s20  ;;  %2264 = vrot.lane.b32.xlu0 %v3846_v10, %s3773_s20  ;;  %v768_v17 = vsel %vm298_vm1, %v756_v7, 0 }
  0xd5   : > { %3581 = vmatprep.subr.msk.bf16.mxu0 %vm298_vm1, %v755_v5 }
  0xd6   : > { %788 = vmatpush1.bf16.msra.mxu0 %v762_v6  ;;  %v862_v9 = vpop.permute.xlu1 %861  ;;  %v752_v12 = vpop.permute.xlu0 %751 }
  0xd7   : > { %v757_v16 = vsel %vm753_vm6, %v750_v3, %v752_v12  ;;  %vm2510_vm6 = vcmask 310272  }
  0xd8   : > { %2270 = vrot.lane.b32.xlu1 %v3861_v14, %s3773_s20  ;;  %2268 = vrot.lane.b32.xlu0 %v3849_v11, %s3773_s20 }
  0xd9   : > { %3583 = vmatprep.subr.msk.bf16.mxu1 %vm298_vm1, %v757_v16  ;;  %3582 = vmatmul.mubr.msk.bf16.vlgmr.msra.gmra.mxu0 %vm294_vm2, %v3580_v15 }
  0xda   : > { %829 = vmatpush1.bf16.msra.mxu1 %v768_v17  ;;  %v866_v18 = vpop.permute.xlu1 %865  ;;  %v864_v19 = vpop.permute.xlu0 %863  ;;  %923 = vmatprep.mubr.bf16.mxu0 %v3757_v13 }
  0xdb   : > { %v872_v20 = vsel %vm871_vm7, %v862_v9, %v864_v19  ;;  %v873_v21 = vsel %vm871_vm7, %v864_v19, %v866_v18 }
  0xdc   : > { %2382 = vrot.lane.b32.xlu1 %v3846_v10, %s3774_s22  ;;  %2272 = vrot.lane.b32.xlu0 %v3954_v39, %s3773_s20  ;;  %v880_v22 = vsel %vm298_vm1, %v872_v20, 0 }
  0xdd   : > { %3586 = vmatprep.subr.msk.bf16.mxu0 %vm298_vm1, %v873_v21  ;;  %3584 = vmatmul.mubr.msk.bf16.vlgmr.msra.gmra.mxu1 %vm294_vm2, %v3580_v15  ;;  %v3605_v15 = vld [vmem:[%s4419_s1 + $0x24] sm:$0xf] }
  0xde   : > { %906 = vmatpush1.bf16.msra.mxu0 %v880_v22  ;;  %v870_v23 = vpop.permute.xlu1 %869  ;;  %v868_v24 = vpop.permute.xlu0 %867  ;;  %964 = vmatprep.mubr.bf16.mxu1 %v3757_v13 }
  0xdf   : > { %v874_v26 = vsel %vm871_vm7, %v866_v18, %v868_v24  ;;  %v875_v27 = vsel %vm871_vm7, %v868_v24, %v870_v23  ;;  %vm2628_vm7 = vcmask 302080  }
  0xe0   : > { %2386 = vrot.lane.b32.xlu1 %v3849_v11, %s3774_s22  ;;  %2384 = vrot.lane.b32.xlu0 %v3841_v8, %s3774_s22  ;;  %v886_v28 = vsel %vm298_vm1, %v874_v26, 0 }
  0xe1   : > { %3588 = vmatprep.subr.msk.bf16.mxu1 %vm298_vm1, %v875_v27  ;;  %3587 = vmatmul.mubr.msk.bf16.vlgmr.msra.gmra.mxu0 %vm294_vm2, %v3585_v25 }
  0xe2   : > { %947 = vmatpush1.bf16.msra.mxu1 %v886_v28  ;;  %v982_v29 = vpop.permute.xlu1 %981  ;;  %v980_v30 = vpop.permute.xlu0 %979  ;;  %1041 = vmatprep.mubr.bf16.mxu0 %v3757_v13 }
  0xe3   : > { %v990_v31 = vsel %vm989_vm8, %v980_v30, %v982_v29 }
  0xe4   : > { %2390 = vrot.lane.b32.xlu1 %v3954_v39, %s3774_s22  ;;  %2388 = vrot.lane.b32.xlu0 %v3861_v14, %s3774_s22  ;;  %v998_v35 = vsel %vm298_vm1, %v990_v31, 0 }
  0xe5   : > { %3589 = vmatmul.mubr.msk.bf16.vlgmr.msra.gmra.mxu1 %vm294_vm2, %v3585_v25 }
  0xe6   : > { %v986_v32 = vpop.permute.xlu1 %985  ;;  %v984_v33 = vpop.permute.xlu0 %983  ;;  %1082 = vmatprep.mubr.bf16.mxu1 %v3757_v13 }
  0xe7   : > { %v991_v34 = vsel %vm989_vm8, %v982_v29, %v984_v33  ;;  %v992_v36 = vsel %vm989_vm8, %v984_v33, %v986_v32  ;;  %v3610_v29 = vld [vmem:[%s4419_s1 + $0x28] sm:$0xf] }
  0xe8   : > { %2502 = vrot.lane.b32.xlu1 %v3841_v8, %s3775_s25  ;;  %2500 = vrot.lane.b32.xlu0 %v3846_v10, %s3775_s25  ;;  %v1004_v42 = vsel %vm298_vm1, %v992_v36, 0 }
  0xe9   : > { %3591 = vmatprep.subr.msk.bf16.mxu0 %vm298_vm1, %v991_v34 }
  0xea   : > { %1024 = vmatpush1.bf16.msra.mxu0 %v998_v35  ;;  %v1098_v37 = vpop.permute.xlu1 %1097  ;;  %v988_v38 = vpop.permute.xlu0 %987 }
  0xeb   : > { %v993_v41 = vsel %vm989_vm8, %v986_v32, %v988_v38  ;;  %vm2746_vm8 = vcmask 236544  }
  0xec   : > { %2506 = vrot.lane.b32.xlu1 %v3861_v14, %s3775_s25  ;;  %2504 = vrot.lane.b32.xlu0 %v3849_v11, %s3775_s25 }
  0xed   : > { %3592 = vmatmul.mubr.msk.bf16.vlgmr.msra.gmra.mxu0 %vm294_vm2, %v3590_v40  ;;  %3593 = vmatprep.subr.msk.bf16.mxu1 %vm298_vm1, %v993_v41 }
  0xee   : > { %1065 = vmatpush1.bf16.msra.mxu1 %v1004_v42  ;;  %v1102_v43 = vpop.permute.xlu1 %1101  ;;  %v1100_v44 = vpop.permute.xlu0 %1099  ;;  %1159 = vmatprep.mubr.bf16.mxu0 %v3757_v13 }
  0xef   : > { %v1108_v45 = vsel %vm1107_vm9, %v1098_v37, %v1100_v44  ;;  %v1109_v46 = vsel %vm1107_vm9, %v1100_v44, %v1102_v43 }
  0xf0   : > { %v1116_v47 = vsel %vm298_vm1, %v1108_v45, 0  ;;  %2618 = vrot.lane.b32.xlu1 %v3846_v10, %s3776_s28  ;;  %2508 = vrot.lane.b32.xlu0 %v3954_v39, %s3775_s25 }
  0xf1   : > { %3594 = vmatmul.mubr.msk.bf16.vlgmr.msra.gmra.mxu1 %vm294_vm2, %v3590_v40  ;;  %3596 = vmatprep.subr.msk.bf16.mxu0 %vm298_vm1, %v1109_v46  ;;  %v3615_v40 = vld [vmem:[%s4419_s1 + $0x2c] sm:$0xf] }
  0xf2   : > { %1142 = vmatpush1.bf16.msra.mxu0 %v1116_v47  ;;  %v1106_v48 = vpop.permute.xlu1 %1105  ;;  %v1104_v49 = vpop.permute.xlu0 %1103  ;;  %1200 = vmatprep.mubr.bf16.mxu1 %v3757_v13 }
  0xf3   : > { %v1110_v51 = vsel %vm1107_vm9, %v1102_v43, %v1104_v49  ;;  %v1111_v52 = vsel %vm1107_vm9, %v1104_v49, %v1106_v48  ;;  %vm2864_vm9 = vcmask 228352  }
  0xf4   : > { %v1122_v53 = vsel %vm298_vm1, %v1110_v51, 0  ;;  %2622 = vrot.lane.b32.xlu1 %v3849_v11, %s3776_s28  ;;  %2620 = vrot.lane.b32.xlu0 %v3841_v8, %s3776_s28 }
  0xf5   : > { %3597 = vmatmul.mubr.msk.bf16.vlgmr.msra.gmra.mxu0 %vm294_vm2, %v3595_v50  ;;  %3598 = vmatprep.subr.msk.bf16.mxu1 %vm298_vm1, %v1111_v52 }
  0xf6   : > { %1183 = vmatpush1.bf16.msra.mxu1 %v1122_v53  ;;  %v1218_v54 = vpop.permute.xlu1 %1217  ;;  %v1216_v55 = vpop.permute.xlu0 %1215  ;;  %1277 = vmatprep.mubr.bf16.mxu0 %v3757_v13 }
  0xf7   : > { %v1226_v56 = vsel %vm1225_vm10, %v1216_v55, %v1218_v54 }
  0xf8   : > { %2626 = vrot.lane.b32.xlu1 %v3954_v39, %s3776_s28  ;;  %2624 = vrot.lane.b32.xlu0 %v3861_v14, %s3776_s28  ;;  %v1234_v60 = vsel %vm298_vm1, %v1226_v56, 0  ;;  %v1809_v56 = vsel %vm298_vm1, %v3846_v10, 0 }
  0xf9   : > { %3599 = vmatmul.mubr.msk.bf16.vlgmr.msra.gmra.mxu1 %vm294_vm2, %v3595_v50 }
  0xfa   : > { %v1222_v57 = vpop.permute.xlu1 %1221  ;;  %v1220_v58 = vpop.permute.xlu0 %1219  ;;  %1318 = vmatprep.mubr.bf16.mxu1 %v3757_v13 }
  0xfb   : > { %v1227_v59 = vsel %vm1225_vm10, %v1218_v54, %v1220_v58  ;;  %v1228_v61 = vsel %vm1225_vm10, %v1220_v58, %v1222_v57  ;;  %v3620_v54 = vld [vmem:[%s4419_s1 + $0x30] sm:$0xf] }
  0xfc   : > { %2738 = vrot.lane.b32.xlu1 %v3841_v8, %s3777_s4  ;;  %2736 = vrot.lane.b32.xlu0 %v3846_v10, %s3777_s4  ;;  %v1240_v2 = vsel %vm298_vm1, %v1228_v61, 0  ;;  %v1815_v61 = vsel %vm298_vm1, %v3849_v11, 0 }
  0xfd   : > { %3601 = vmatprep.subr.msk.bf16.mxu0 %vm298_vm1, %v1227_v59 }
  0xfe   : > { %1260 = vmatpush1.bf16.msra.mxu0 %v1234_v60  ;;  %v1334_v62 = vpop.permute.xlu1 %1333  ;;  %v1224_v63 = vpop.permute.xlu0 %1223 }
  0xff   : > { %v1229_v1 = vsel %vm1225_vm10, %v1222_v57, %v1224_v63  ;;  %vm2982_vm10 = vcmask 220160  }
 0x100   : > { %2742 = vrot.lane.b32.xlu1 %v3861_v14, %s3777_s4  ;;  %2740 = vrot.lane.b32.xlu0 %v3849_v11, %s3777_s4 }
 0x101   : > { %3602 = vmatmul.mubr.msk.bf16.vlgmr.msra.gmra.mxu0 %vm294_vm2, %v3600_v0  ;;  %3603 = vmatprep.subr.msk.bf16.mxu1 %vm298_vm1, %v1229_v1  ;;  %v3625_v1 = vld [vmem:[%s4419_s1 + $0x34] sm:$0xf] }
 0x102   : > { %1301 = vmatpush1.bf16.msra.mxu1 %v1240_v2  ;;  %v1338_v3 = vpop.permute.xlu1 %1337  ;;  %v1336_v4 = vpop.permute.xlu0 %1335  ;;  %1395 = vmatprep.mubr.bf16.mxu0 %v3757_v13 }
 0x103   : > { %v1344_v5 = vsel %vm1343_vm11, %v1334_v62, %v1336_v4  ;;  %v1345_v6 = vsel %vm1343_vm11, %v1336_v4, %v1338_v3 }
 0x104   : > { %v1352_v7 = vsel %vm298_vm1, %v1344_v5, 0  ;;  %2854 = vrot.lane.b32.xlu1 %v3846_v10, %s3778_s7  ;;  %2744 = vrot.lane.b32.xlu0 %v3954_v39, %s3777_s4 }
 0x105   : > { %3604 = vmatmul.mubr.msk.bf16.vlgmr.msra.gmra.mxu1 %vm294_vm2, %v3600_v0  ;;  %3606 = vmatprep.subr.msk.bf16.mxu0 %vm298_vm1, %v1345_v6 }
 0x106   : > { %1378 = vmatpush1.bf16.msra.mxu0 %v1352_v7  ;;  %v1342_v9 = vpop.permute.xlu1 %1341  ;;  %v1340_v12 = vpop.permute.xlu0 %1339  ;;  %1436 = vmatprep.mubr.bf16.mxu1 %v3757_v13 }
 0x107   : > { %v1346_v16 = vsel %vm1343_vm11, %v1338_v3, %v1340_v12  ;;  %v1347_v17 = vsel %vm1343_vm11, %v1340_v12, %v1342_v9  ;;  %v3630_v9 = vld [vmem:[%s4419_s1 + $0x38] sm:$0xf]  ;;  %vm3100_vm11 = vcmask 154624  }
 0x108   : > { %v1358_v18 = vsel %vm298_vm1, %v1346_v16, 0  ;;  %2858 = vrot.lane.b32.xlu1 %v3849_v11, %s3778_s7  ;;  %2856 = vrot.lane.b32.xlu0 %v3841_v8, %s3778_s7 }
 0x109   : > { %3607 = vmatmul.mubr.msk.bf16.vlgmr.msra.gmra.mxu0 %vm294_vm2, %v3605_v15  ;;  %3608 = vmatprep.subr.msk.bf16.mxu1 %vm298_vm1, %v1347_v17 }
 0x10a   : > { %1419 = vmatpush1.bf16.msra.mxu1 %v1358_v18  ;;  %v1454_v19 = vpop.permute.xlu1 %1453  ;;  %v1452_v20 = vpop.permute.xlu0 %1451  ;;  %1513 = vmatprep.mubr.bf16.mxu0 %v3757_v13 }
 0x10b   : > { %v1462_v21 = vsel %vm1461_vm12, %v1452_v20, %v1454_v19 }
 0x10c   : > { %2862 = vrot.lane.b32.xlu1 %v3954_v39, %s3778_s7  ;;  %2860 = vrot.lane.b32.xlu0 %v3861_v14, %s3778_s7  ;;  %v1470_v25 = vsel %vm298_vm1, %v1462_v21, 0  ;;  %v3636_v21 = vld [vmem:[%s4419_s1 + $0x3c] sm:$0xf] }
 0x10d   : > { %3609 = vmatmul.mubr.msk.bf16.vlgmr.msra.gmra.mxu1 %vm294_vm2, %v3605_v15 }
 0x10e   : > { %v1458_v22 = vpop.permute.xlu1 %1457  ;;  %v1456_v23 = vpop.permute.xlu0 %1455  ;;  %1554 = vmatprep.mubr.bf16.mxu1 %v3757_v13 }
 0x10f   : > { %v1463_v24 = vsel %vm1461_vm12, %v1454_v19, %v1456_v23  ;;  %v1464_v26 = vsel %vm1461_vm12, %v1456_v23, %v1458_v22 }
 0x110   : > { %2974 = vrot.lane.b32.xlu1 %v3841_v8, %s3779_s10  ;;  %2972 = vrot.lane.b32.xlu0 %v3846_v10, %s3779_s10  ;;  %v1476_v31 = vsel %vm298_vm1, %v1464_v26, 0 }
 0x111   : > { %3611 = vmatprep.subr.msk.bf16.mxu0 %vm298_vm1, %v1463_v24 }
 0x112   : > { %1496 = vmatpush1.bf16.msra.mxu0 %v1470_v25  ;;  %v1570_v27 = vpop.permute.xlu1 %1569  ;;  %v1460_v28 = vpop.permute.xlu0 %1459 }
 0x113   : > { %v1465_v30 = vsel %vm1461_vm12, %v1458_v22, %v1460_v28  ;;  %vm3218_vm12 = vcmask 146432  }
 0x114   : > { %2978 = vrot.lane.b32.xlu1 %v3861_v14, %s3779_s10  ;;  %2976 = vrot.lane.b32.xlu0 %v3849_v11, %s3779_s10 }
 0x115   : > { %3612 = vmatmul.mubr.msk.bf16.vlgmr.msra.gmra.mxu0 %vm294_vm2, %v3610_v29  ;;  %3613 = vmatprep.subr.msk.bf16.mxu1 %vm298_vm1, %v1465_v30 }
 0x116   : > { %1537 = vmatpush1.bf16.msra.mxu1 %v1476_v31  ;;  %v1574_v32 = vpop.permute.xlu1 %1573  ;;  %v1572_v33 = vpop.permute.xlu0 %1571  ;;  %1631 = vmatprep.mubr.bf16.mxu0 %v3757_v13 }
 0x117   : > { %v1580_v34 = vsel %vm1579_vm13, %v1570_v27, %v1572_v33  ;;  %v1581_v35 = vsel %vm1579_vm13, %v1572_v33, %v1574_v32 }
 0x118   : > { %v1588_v36 = vsel %vm298_vm1, %v1580_v34, 0  ;;  %3090 = vrot.lane.b32.xlu1 %v3846_v10, %s3780_s15  ;;  %2980 = vrot.lane.b32.xlu0 %v3954_v39, %s3779_s10 }
 0x119   : > { %3614 = vmatmul.mubr.msk.bf16.vlgmr.msra.gmra.mxu1 %vm294_vm2, %v3610_v29  ;;  %3616 = vmatprep.subr.msk.bf16.mxu0 %vm298_vm1, %v1581_v35 }
 0x11a   : > { %1614 = vmatpush1.bf16.msra.mxu0 %v1588_v36  ;;  %v1578_v37 = vpop.permute.xlu1 %1577  ;;  %v1576_v38 = vpop.permute.xlu0 %1575  ;;  %1672 = vmatprep.mubr.bf16.mxu1 %v3757_v13 }
 0x11b   : > { %v1582_v41 = vsel %vm1579_vm13, %v1574_v32, %v1576_v38  ;;  %v1583_v42 = vsel %vm1579_vm13, %v1576_v38, %v1578_v37  ;;  %v3641_v32 = vld [vmem:[%s4419_s1 + $0x40] sm:$0xf]  ;;  %vm3336_vm13 = vcmask 138240  }
 0x11c   : > { %v1594_v43 = vsel %vm298_vm1, %v1582_v41, 0  ;;  %3094 = vrot.lane.b32.xlu1 %v3849_v11, %s3780_s15  ;;  %3092 = vrot.lane.b32.xlu0 %v3841_v8, %s3780_s15 }
 0x11d   : > { %3617 = vmatmul.mubr.msk.bf16.vlgmr.msra.gmra.mxu0 %vm294_vm2, %v3615_v40  ;;  %3618 = vmatprep.subr.msk.bf16.mxu1 %vm298_vm1, %v1583_v42  ;;  %v3646_v42 = vld [vmem:[%s4419_s1 + $0x44] sm:$0xf] }
 0x11e   : > { %1655 = vmatpush1.bf16.msra.mxu1 %v1594_v43  ;;  %v1690_v44 = vpop.permute.xlu1 %1689  ;;  %v1688_v45 = vpop.permute.xlu0 %1687  ;;  %1749 = vmatprep.mubr.bf16.mxu0 %v3757_v13 }
 0x11f   : > { %v1698_v46 = vsel %vm1697_vm14, %v1688_v45, %v1690_v44 }
 0x120   : > { %3098 = vrot.lane.b32.xlu1 %v3954_v39, %s3780_s15  ;;  %3096 = vrot.lane.b32.xlu0 %v3861_v14, %s3780_s15  ;;  %v1706_v50 = vsel %vm298_vm1, %v1698_v46, 0 }
 0x121   : > { %3619 = vmatmul.mubr.msk.bf16.vlgmr.msra.gmra.mxu1 %vm294_vm2, %v3615_v40 }
 0x122   : > { %v1694_v47 = vpop.permute.xlu1 %1693  ;;  %v1692_v48 = vpop.permute.xlu0 %1691  ;;  %1790 = vmatprep.mubr.bf16.mxu1 %v3757_v13 }
 0x123   : > { %v1699_v49 = vsel %vm1697_vm14, %v1690_v44, %v1692_v48  ;;  %v1700_v51 = vsel %vm1697_vm14, %v1692_v48, %v1694_v47 }
 0x124   : > { %3210 = vrot.lane.b32.xlu1 %v3841_v8, %s3781_s19  ;;  %3208 = vrot.lane.b32.xlu0 %v3846_v10, %s3781_s19  ;;  %v1712_v57 = vsel %vm298_vm1, %v1700_v51, 0 }
 0x125   : > { %3621 = vmatprep.subr.msk.bf16.mxu0 %vm298_vm1, %v1699_v49 }
 0x126   : > { %1732 = vmatpush1.bf16.msra.mxu0 %v1706_v50  ;;  %v1911_v52 = vpop.permute.xlu1 %1910  ;;  %v1696_v53 = vpop.permute.xlu0 %1695 }
 0x127   : > { %v1701_v55 = vsel %vm1697_vm14, %v1694_v47, %v1696_v53  ;;  %3626 = vmatprep.subr.msk.bf16.mxu0 %vm298_vm1, %v3841_v8 }
 0x128   : > { %3214 = vrot.lane.b32.xlu1 %v3861_v14, %s3781_s19  ;;  %3212 = vrot.lane.b32.xlu0 %v3849_v11, %s3781_s19 }
 0x129   : > { %3622 = vmatmul.mubr.msk.bf16.vlgmr.msra.gmra.mxu0 %vm294_vm2, %v3620_v54  ;;  %3623 = vmatprep.subr.msk.bf16.mxu1 %vm298_vm1, %v1701_v55 }
 0x12a   : > { %1773 = vmatpush1.bf16.msra.mxu1 %v1712_v57  ;;  %v1915_v58 = vpop.permute.xlu1 %1914  ;;  %v1913_v59 = vpop.permute.xlu0 %1912  ;;  %1835 = vmatpush1.bf16.msra.mxu0 %v1809_v56 }
 0x12b   : > { %v1922_v60 = vsel %vm1920_vm15, %v1913_v59, %v1915_v58  ;;  %3628 = vmatprep.subr.msk.bf16.mxu1 %vm298_vm1, %v3861_v14  ;;  %1852 = vmatprep.mubr.bf16.mxu0 %v3757_v13  ;;  %v1921_v62 = vsel %vm1920_vm15, %v1911_v52, %v1913_v59  ;;  %v3651_v52 = vld [vmem:[%s4419_s1 + $0x48] sm:$0xf] }
 0x12c   : > { %3326 = vrot.lane.b32.xlu1 %v3846_v10, %s3782_s21  ;;  %3216 = vrot.lane.b32.xlu0 %v3954_v39, %s3781_s19  ;;  %v1929_v10 = vsel %vm298_vm1, %v1921_v62, 0 }
 0x12d   : > { %3624 = vmatmul.mubr.msk.bf16.vlgmr.msra.gmra.mxu1 %vm294_vm2, %v3620_v54  ;;  %3632 = vmatprep.subr.msk.bf16.mxu0 %vm298_vm1, %v1922_v60 }
 0x12e   : > { %v1919_v63 = vpop.permute.xlu1 %1918  ;;  %v1917_v0 = vpop.permute.xlu0 %1916  ;;  %1876 = vmatpush1.bf16.msra.mxu1 %v1815_v61  ;;  %1893 = vmatprep.mubr.bf16.mxu1 %v3757_v13 }
 0x12f   : > { %v1924_v2 = vsel %vm1920_vm15, %v1917_v0, %v1919_v63  ;;  %v1923_v3 = vsel %vm1920_vm15, %v1915_v58, %v1917_v0  ;;  %v3656_v0 = vld [vmem:[%s4419_s1 + $0x4c] sm:$0xf] }
 0x130   : > { %3330 = vrot.lane.b32.xlu1 %v3849_v11, %s3782_s21  ;;  %3328 = vrot.lane.b32.xlu0 %v3841_v8, %s3782_s21  ;;  %v1935_v8 = vsel %vm298_vm1, %v1923_v3, 0 }
 0x131   : > { %3627 = vmatmul.mubr.msk.bf16.vlgmr.msra.gmra.mxu0 %vm294_vm2, %v3625_v1  ;;  %3634 = vmatprep.subr.msk.bf16.mxu1 %vm298_vm1, %v1924_v2 }
 0x132   : > { %1955 = vmatpush1.bf16.msra.mxu0 %v1929_v10  ;;  %v2031_v4 = vpop.permute.xlu1 %2030  ;;  %v2029_v5 = vpop.permute.xlu0 %2028  ;;  %1972 = vmatprep.mubr.bf16.mxu0 %v3757_v13 }
 0x133   : > { %v2039_v11 = vsel %vm2038_vm0, %v2029_v5, %v2031_v4 }
 0x134   : > { %3334 = vrot.lane.b32.xlu1 %v3954_v39, %s3782_s21  ;;  %3332 = vrot.lane.b32.xlu0 %v3861_v14, %s3782_s21  ;;  %v2047_v14 = vsel %vm298_vm1, %v2039_v11, 0 }
 0x135   : > { %3629 = vmatmul.mubr.msk.bf16.vlgmr.msra.gmra.mxu1 %vm294_vm2, %v3625_v1 }
 0x136   : > { %1996 = vmatpush1.bf16.msra.mxu1 %v1935_v8  ;;  %v2035_v6 = vpop.permute.xlu1 %2034  ;;  %v2033_v7 = vpop.permute.xlu0 %2032  ;;  %2013 = vmatprep.mubr.bf16.mxu1 %v3757_v13 }
 0x137   : > { %v2040_v12 = vsel %vm2038_vm0, %v2031_v4, %v2033_v7  ;;  %v2041_v39 = vsel %vm2038_vm0, %v2033_v7, %v2035_v6  ;;  %v3661_v7 = vld [vmem:[%s4419_s1 + $0x50] sm:$0xf] }
 0x138   : > { %3637 = vmatprep.subr.msk.bf16.mxu0 %vm298_vm1, %v2040_v12  ;;  %v2053_v18 = vsel %vm298_vm1, %v2041_v39, 0 }
 0x139   : > { %3633 = vmatmul.mubr.msk.bf16.vlgmr.msra.gmra.mxu0 %vm294_vm2, %v3630_v9 }
 0x13a   : > { %2073 = vmatpush1.bf16.msra.mxu0 %v2047_v14  ;;  %v2147_v15 = vpop.permute.xlu1 %2146  ;;  %v2037_v16 = vpop.permute.xlu0 %2036  ;;  %2090 = vmatprep.mubr.bf16.mxu0 %v3757_v13 }
 0x13b   : > { %v2042_v17 = vsel %vm2038_vm0, %v2035_v6, %v2037_v16 }
 0x13c   : > { %3639 = vmatprep.subr.msk.bf16.mxu1 %vm298_vm1, %v2042_v17 }
 0x13d   : > { %3635 = vmatmul.mubr.msk.bf16.vlgmr.msra.gmra.mxu1 %vm294_vm2, %v3630_v9 }
 0x13e   : > { %2114 = vmatpush1.bf16.msra.mxu1 %v2053_v18  ;;  %v2151_v19 = vpop.permute.xlu1 %2150  ;;  %v2149_v20 = vpop.permute.xlu0 %2148  ;;  %2131 = vmatprep.mubr.bf16.mxu1 %v3757_v13  ;;  %v3442_v18 = vld [vmem:[%s4420_s2] sm:$0xff] }
 0x13f   : > { %v2157_v22 = vsel %vm2156_vm3, %v2147_v15, %v2149_v20  ;;  %v2158_v23 = vsel %vm2156_vm3, %v2149_v20, %v2151_v19  ;;  %3445 = vperm.xlu0 %3739, %v3442_v18  }
 0x140   : > { %v2165_v24 = vsel %vm298_vm1, %v2157_v22, 0  ;;  %3642 = vmatprep.subr.msk.bf16.mxu0 %vm298_vm1, %v2158_v23 }
 0x141   : > { %3638 = vmatmul.mubr.msk.bf16.vlgmr.msra.gmra.mxu0 %vm294_vm2, %v3636_v21 }
 0x142   : > { %2191 = vmatpush1.bf16.msra.mxu0 %v2165_v24  ;;  %v2155_v25 = vpop.permute.xlu1 %2154  ;;  %v2153_v26 = vpop.permute.xlu0 %2152  ;;  %2208 = vmatprep.mubr.bf16.mxu0 %v3757_v13 }
 0x143   : > { %v2159_v27 = vsel %vm2156_vm3, %v2151_v19, %v2153_v26  ;;  %v2160_v28 = vsel %vm2156_vm3, %v2153_v26, %v2155_v25 }
 0x144   : > { %v2171_v29 = vsel %vm298_vm1, %v2159_v27, 0  ;;  %3644 = vmatprep.subr.msk.bf16.mxu1 %vm298_vm1, %v2160_v28  ;;  %v3666_v27 = vld [vmem:[%s4419_s1 + $0x54] sm:$0xf] }
 0x145   : > { %3640 = vmatmul.mubr.msk.bf16.vlgmr.msra.gmra.mxu1 %vm294_vm2, %v3636_v21 }
 0x146   : > { %2232 = vmatpush1.bf16.msra.mxu1 %v2171_v29  ;;  %v2267_v30 = vpop.permute.xlu1 %2266  ;;  %v2265_v31 = vpop.permute.xlu0 %2264  ;;  %2249 = vmatprep.mubr.bf16.mxu1 %v3757_v13 }
 0x147   : > { %v2275_v33 = vsel %vm2274_vm4, %v2265_v31, %v2267_v30 }
 0x148   : > { %v2283_v37 = vsel %vm298_vm1, %v2275_v33, 0 }
 0x149   : > { %3643 = vmatmul.mubr.msk.bf16.vlgmr.msra.gmra.mxu0 %vm294_vm2, %v3641_v32 }
 0x14a   : > { %v2271_v34 = vpop.permute.xlu1 %2270  ;;  %v2269_v35 = vpop.permute.xlu0 %2268  ;;  %2326 = vmatprep.mubr.bf16.mxu0 %v3757_v13 }
 0x14b   : > { %v2276_v36 = vsel %vm2274_vm4, %v2267_v30, %v2269_v35  ;;  %v2277_v38 = vsel %vm2274_vm4, %v2269_v35, %v2271_v34 }
 0x14c   : > { %3647 = vmatprep.subr.msk.bf16.mxu0 %vm298_vm1, %v2276_v36  ;;  %v2289_v44 = vsel %vm298_vm1, %v2277_v38, 0 }
 0x14d   : > { %3645 = vmatmul.mubr.msk.bf16.vlgmr.msra.gmra.mxu1 %vm294_vm2, %v3641_v32  ;;  %2309 = vmatpush1.bf16.msra.mxu0 %v2283_v37 }
 0x14e   : > { %v2383_v40 = vpop.permute.xlu1 %2382  ;;  %v2273_v41 = vpop.permute.xlu0 %2272  ;;  %2367 = vmatprep.mubr.bf16.mxu1 %v3757_v13 }
 0x14f   : > { %v2278_v43 = vsel %vm2274_vm4, %v2271_v34, %v2273_v41 }
 0x150   : > { %3649 = vmatprep.subr.msk.bf16.mxu1 %vm298_vm1, %v2278_v43 }
 0x151   : > { %3648 = vmatmul.mubr.msk.bf16.vlgmr.msra.gmra.mxu0 %vm294_vm2, %v3646_v42  ;;  %2350 = vmatpush1.bf16.msra.mxu1 %v2289_v44 }
 0x152   : > { %v2387_v45 = vpop.permute.xlu1 %2386  ;;  %v2385_v46 = vpop.permute.xlu0 %2384  ;;  %2444 = vmatprep.mubr.bf16.mxu0 %v3757_v13 }
 0x153   : > { %v2393_v47 = vsel %vm2392_vm5, %v2383_v40, %v2385_v46  ;;  %v2394_v48 = vsel %vm2392_vm5, %v2385_v46, %v2387_v45 }
 0x154   : > { %v2401_v49 = vsel %vm298_vm1, %v2393_v47, 0  ;;  %3652 = vmatprep.subr.msk.bf16.mxu0 %vm298_vm1, %v2394_v48  ;;  %v3671_v48 = vld [vmem:[%s4419_s1 + $0x58] sm:$0xf] }
 0x155   : > { %3650 = vmatmul.mubr.msk.bf16.vlgmr.msra.gmra.mxu1 %vm294_vm2, %v3646_v42  ;;  %2427 = vmatpush1.bf16.msra.mxu0 %v2401_v49 }
 0x156   : > { %v2391_v50 = vpop.permute.xlu1 %2390  ;;  %v2389_v51 = vpop.permute.xlu0 %2388  ;;  %2485 = vmatprep.mubr.bf16.mxu1 %v3757_v13 }
 0x157   : > { %v2395_v53 = vsel %vm2392_vm5, %v2387_v45, %v2389_v51  ;;  %v2396_v54 = vsel %vm2392_vm5, %v2389_v51, %v2391_v50 }
 0x158   : > { %v2407_v55 = vsel %vm298_vm1, %v2395_v53, 0  ;;  %3654 = vmatprep.subr.msk.bf16.mxu1 %vm298_vm1, %v2396_v54 }
 0x159   : > { %3653 = vmatmul.mubr.msk.bf16.vlgmr.msra.gmra.mxu0 %vm294_vm2, %v3651_v52  ;;  %2468 = vmatpush1.bf16.msra.mxu1 %v2407_v55 }
 0x15a   : > { %v2503_v56 = vpop.permute.xlu1 %2502  ;;  %v2501_v57 = vpop.permute.xlu0 %2500  ;;  %2562 = vmatprep.mubr.bf16.mxu0 %v3757_v13 }
 0x15b   : > { %v2511_v58 = vsel %vm2510_vm6, %v2501_v57, %v2503_v56 }
 0x15c   : > { %v2519_v62 = vsel %vm298_vm1, %v2511_v58, 0 }
 0x15d   : > { %3655 = vmatmul.mubr.msk.bf16.vlgmr.msra.gmra.mxu1 %vm294_vm2, %v3651_v52 }
 0x15e   : > { %v2507_v59 = vpop.permute.xlu1 %2506  ;;  %v2505_v60 = vpop.permute.xlu0 %2504  ;;  %2603 = vmatprep.mubr.bf16.mxu1 %v3757_v13 }
 0x15f   : > { %v2512_v61 = vsel %vm2510_vm6, %v2503_v56, %v2505_v60  ;;  %v2513_v63 = vsel %vm2510_vm6, %v2505_v60, %v2507_v59 }
 0x160   : > { %3657 = vmatprep.subr.msk.bf16.mxu0 %vm298_vm1, %v2512_v61  ;;  %v2525_v3 = vsel %vm298_vm1, %v2513_v63, 0 }
 0x161   : > { %2545 = vmatpush1.bf16.msra.mxu0 %v2519_v62 }
 0x162   : > { %v2619_v1 = vpop.permute.xlu1 %2618  ;;  %v2509_v2 = vpop.permute.xlu0 %2508 }
 0x163   : > { %v2514_v10 = vsel %vm2510_vm6, %v2507_v59, %v2509_v2 }
 0x164   : > { %3658 = vmatmul.mubr.msk.bf16.vlgmr.msra.gmra.mxu0 %vm294_vm2, %v3656_v0  ;;  %3659 = vmatprep.subr.msk.bf16.mxu1 %vm298_vm1, %v2514_v10 }
 0x165   : > { %2586 = vmatpush1.bf16.msra.mxu1 %v2525_v3  ;;  %2680 = vmatprep.mubr.bf16.mxu0 %v3757_v13 }
 0x166   : > { %v2623_v4 = vpop.permute.xlu1 %2622  ;;  %v2621_v5 = vpop.permute.xlu0 %2620 }
 0x167   : > { %v2629_v8 = vsel %vm2628_vm7, %v2619_v1, %v2621_v5  ;;  %v2630_v11 = vsel %vm2628_vm7, %v2621_v5, %v2623_v4 }
 0x168   : > { %v2637_v6 = vsel %vm298_vm1, %v2629_v8, 0  ;;  %3660 = vmatmul.mubr.msk.bf16.vlgmr.msra.gmra.mxu1 %vm294_vm2, %v3656_v0  ;;  %3662 = vmatprep.subr.msk.bf16.mxu0 %vm298_vm1, %v2630_v11 }
 0x169   : > { %2663 = vmatpush1.bf16.msra.mxu0 %v2637_v6  ;;  %2721 = vmatprep.mubr.bf16.mxu1 %v3757_v13 }
 0x16a   : > { %v2627_v9 = vpop.permute.xlu1 %2626  ;;  %v2625_v12 = vpop.permute.xlu0 %2624 }
 0x16b   : > { %v2631_v14 = vsel %vm2628_vm7, %v2623_v4, %v2625_v12  ;;  %v2632_v39 = vsel %vm2628_vm7, %v2625_v12, %v2627_v9 }
 0x16c   : > { %v2643_v15 = vsel %vm298_vm1, %v2631_v14, 0  ;;  %3663 = vmatmul.mubr.msk.bf16.vlgmr.msra.gmra.mxu0 %vm294_vm2, %v3661_v7  ;;  %3664 = vmatprep.subr.msk.bf16.mxu1 %vm298_vm1, %v2632_v39 }
 0x16d   : > { %2704 = vmatpush1.bf16.msra.mxu1 %v2643_v15  ;;  %2798 = vmatprep.mubr.bf16.mxu0 %v3757_v13 }
 0x16e   : > { %v2739_v16 = vpop.permute.xlu1 %2738  ;;  %v2737_v17 = vpop.permute.xlu0 %2736 }
 0x16f   : > { %v2747_v19 = vsel %vm2746_vm8, %v2737_v17, %v2739_v16 }
 0x170   : > { %3665 = vmatmul.mubr.msk.bf16.vlgmr.msra.gmra.mxu1 %vm294_vm2, %v3661_v7  ;;  %v2755_v25 = vsel %vm298_vm1, %v2747_v19, 0  ;;  %v3676_v7 = vld [vmem:[%s4419_s1 + $0x5c] sm:$0xf] }
 0x171   : > { %2839 = vmatprep.mubr.bf16.mxu1 %v3757_v13  ;;  %v345_v20 = vpop.f32.mrf.mxu0 }
 0x172   : > { %v2743_v21 = vpop.permute.xlu1 %2742  ;;  %v2741_v22 = vpop.permute.xlu0 %2740 }
 0x173   : > { %v2748_v23 = vsel %vm2746_vm8, %v2739_v16, %v2741_v22  ;;  %v347_v24 = vpop.f32.mrf.mxu0  ;;  %v2749_v26 = vsel %vm2746_vm8, %v2741_v22, %v2743_v21 }
 0x174   : > { %3667 = vmatprep.subr.msk.bf16.mxu0 %vm298_vm1, %v2748_v23  ;;  %v2761_v35 = vsel %vm298_vm1, %v2749_v26, 0 }
 0x175   : > { %2781 = vmatpush1.bf16.msra.mxu0 %v2755_v25  ;;  %v386_v28 = vpop.f32.mrf.mxu1  ;;  %v349_v29 = vpop.f32.mrf.mxu0 }
 0x176   : > { %v2855_v30 = vpop.permute.xlu1 %2854  ;;  %v2745_v31 = vpop.permute.xlu0 %2744 }
 0x177   : > { %v2750_v32 = vsel %vm2746_vm8, %v2743_v21, %v2745_v31  ;;  %v388_v33 = vpop.f32.mrf.mxu1  ;;  %v350_v34 = vpop.f32.mrf.mxu0 }
 0x178   : > { %3668 = vmatmul.mubr.msk.bf16.vlgmr.msra.gmra.mxu0 %vm294_vm2, %v3666_v27  ;;  %3669 = vmatprep.subr.msk.bf16.mxu1 %vm298_vm1, %v2750_v32  ;;  %v3681_v32 = vld [vmem:[%s4419_s1 + $0x60] sm:$0xf] }
 0x179   : > { %2822 = vmatpush1.bf16.msra.mxu1 %v2761_v35  ;;  %2916 = vmatprep.mubr.bf16.mxu0 %v3757_v13  ;;  %v390_v36 = vpop.f32.mrf.mxu1  ;;  %v457_v37 = vpop.f32.mrf.mxu0 }
 0x17a   : > { %v2859_v38 = vpop.permute.xlu1 %2858  ;;  %v2857_v40 = vpop.permute.xlu0 %2856  ;;  %v458_v41 = vadd.f32 %v457_v37, %v345_v20 }
 0x17b   : > { %v2865_v42 = vsel %vm2864_vm9, %v2855_v30, %v2857_v40  ;;  %v2866_v43 = vsel %vm2864_vm9, %v2857_v40, %v2859_v38  ;;  %v391_v44 = vpop.f32.mrf.mxu1  ;;  %v459_v45 = vpop.f32.mrf.mxu0 }
 0x17c   : > { %v2873_v46 = vsel %vm298_vm1, %v2865_v42, 0  ;;  %3670 = vmatmul.mubr.msk.bf16.vlgmr.msra.gmra.mxu1 %vm294_vm2, %v3666_v27  ;;  %3672 = vmatprep.subr.msk.bf16.mxu0 %vm298_vm1, %v2866_v43  ;;  %v460_v47 = vadd.f32 %v459_v45, %v347_v24 }
 0x17d   : > { %2899 = vmatpush1.bf16.msra.mxu0 %v2873_v46  ;;  %2957 = vmatprep.mubr.bf16.mxu1 %v3757_v13  ;;  %v498_v49 = vpop.f32.mrf.mxu1  ;;  %v461_v50 = vpop.f32.mrf.mxu0 }
 0x17e   : > { %v2863_v51 = vpop.permute.xlu1 %2862  ;;  %v2861_v52 = vpop.permute.xlu0 %2860  ;;  %v499_v53 = vadd.f32 %v498_v49, %v386_v28 }
 0x17f   : > { %v2867_v54 = vsel %vm2864_vm9, %v2859_v38, %v2861_v52  ;;  %v2868_v55 = vsel %vm2864_vm9, %v2861_v52, %v2863_v51  ;;  %v500_v56 = vpop.f32.mrf.mxu1  ;;  %v462_v57 = vpop.f32.mrf.mxu0 }
 0x180   : > { %v2879_v58 = vsel %vm298_vm1, %v2867_v54, 0  ;;  %3673 = vmatmul.mubr.msk.bf16.vlgmr.msra.gmra.mxu0 %vm294_vm2, %v3671_v48  ;;  %3674 = vmatprep.subr.msk.bf16.mxu1 %vm298_vm1, %v2868_v55  ;;  %v501_v59 = vadd.f32 %v500_v56, %v388_v33 }
 0x181   : > { %2940 = vmatpush1.bf16.msra.mxu1 %v2879_v58  ;;  %v502_v60 = vpop.f32.mrf.mxu1  ;;  %3034 = vmatprep.mubr.bf16.mxu0 %v3757_v13 }
 0x182   : > { %v2975_v61 = vpop.permute.xlu1 %2974  ;;  %v2973_v62 = vpop.permute.xlu0 %2972 }
 0x183   : > { %v503_v63 = vpop.f32.mrf.mxu1  ;;  %v2983_v0 = vsel %vm2982_vm10, %v2973_v62, %v2975_v61 }
 0x184   : > { %3675 = vmatmul.mubr.msk.bf16.vlgmr.msra.gmra.mxu1 %vm294_vm2, %v3671_v48  ;;  %v2991_v8 = vsel %vm298_vm1, %v2983_v0, 0 }
 0x185   : > { %v571_v1 = vpop.f32.mrf.mxu0  ;;  %3075 = vmatprep.mubr.bf16.mxu1 %v3757_v13 }
 0x186   : > { %v2979_v2 = vpop.permute.xlu1 %2978  ;;  %v2977_v10 = vpop.permute.xlu0 %2976  ;;  %v619_v3 = vadd.f32 %v571_v1, %v458_v41 }
 0x187   : > { %v2984_v4 = vsel %vm2982_vm10, %v2975_v61, %v2977_v10  ;;  %v573_v5 = vpop.f32.mrf.mxu0  ;;  %v2985_v6 = vsel %vm2982_vm10, %v2977_v10, %v2979_v2  ;;  %v3686_v61 = vld [vmem:[%s4419_s1 + $0x64] sm:$0xf] }
 0x188   : > { %3677 = vmatprep.subr.msk.bf16.mxu0 %vm298_vm1, %v2984_v4  ;;  %v620_v11 = vadd.f32 %v573_v5, %v460_v47  ;;  %v2997_v19 = vsel %vm298_vm1, %v2985_v6, 0 }
 0x189   : > { %3017 = vmatpush1.bf16.msra.mxu0 %v2991_v8  ;;  %v612_v9 = vpop.f32.mrf.mxu1  ;;  %v575_v12 = vpop.f32.mrf.mxu0 }
 0x18a   : > { %v3091_v14 = vpop.permute.xlu1 %3090  ;;  %v2981_v39 = vpop.permute.xlu0 %2980  ;;  %v621_v15 = vadd.f32 %v612_v9, %v499_v53 }
 0x18b   : > { %v2986_v16 = vsel %vm2982_vm10, %v2979_v2, %v2981_v39  ;;  %v614_v17 = vpop.f32.mrf.mxu1  ;;  %v576_v18 = vpop.f32.mrf.mxu0 }
 0x18c   : > { %3678 = vmatmul.mubr.msk.bf16.vlgmr.msra.gmra.mxu0 %vm294_vm2, %v3676_v7  ;;  %3679 = vmatprep.subr.msk.bf16.mxu1 %vm298_vm1, %v2986_v16  ;;  %v622_v20 = vadd.f32 %v614_v17, %v501_v59 }
 0x18d   : > { %3058 = vmatpush1.bf16.msra.mxu1 %v2997_v19  ;;  %v616_v21 = vpop.f32.mrf.mxu1  ;;  %3152 = vmatprep.mubr.bf16.mxu0 %v3757_v13  ;;  %v689_v22 = vpop.f32.mrf.mxu0  ;;  %v3691_v19 = vld [vmem:[%s4419_s1 + $0x68] sm:$0xf] }
 0x18e   : > { %v3095_v23 = vpop.permute.xlu1 %3094  ;;  %v3093_v24 = vpop.permute.xlu0 %3092  ;;  %v737_v25 = vadd.f32 %v689_v22, %v619_v3 }
 0x18f   : > { %v3101_v26 = vsel %vm3100_vm11, %v3091_v14, %v3093_v24  ;;  %v3102_v27 = vsel %vm3100_vm11, %v3093_v24, %v3095_v23  ;;  %v617_v28 = vpop.f32.mrf.mxu1  ;;  %v691_v29 = vpop.f32.mrf.mxu0 }
 0x190   : > { %v3109_v30 = vsel %vm298_vm1, %v3101_v26, 0  ;;  %3680 = vmatmul.mubr.msk.bf16.vlgmr.msra.gmra.mxu1 %vm294_vm2, %v3676_v7  ;;  %3682 = vmatprep.subr.msk.bf16.mxu0 %vm298_vm1, %v3102_v27  ;;  %v738_v31 = vadd.f32 %v691_v29, %v620_v11 }
 0x191   : > { %3135 = vmatpush1.bf16.msra.mxu0 %v3109_v30  ;;  %v730_v33 = vpop.f32.mrf.mxu1  ;;  %3193 = vmatprep.mubr.bf16.mxu1 %v3757_v13  ;;  %v693_v34 = vpop.f32.mrf.mxu0 }
 0x192   : > { %v3099_v35 = vpop.permute.xlu1 %3098  ;;  %v3097_v36 = vpop.permute.xlu0 %3096  ;;  %v739_v37 = vadd.f32 %v730_v33, %v621_v15 }
 0x193   : > { %v3103_v38 = vsel %vm3100_vm11, %v3095_v23, %v3097_v36  ;;  %v3104_v40 = vsel %vm3100_vm11, %v3097_v36, %v3099_v35  ;;  %v732_v41 = vpop.f32.mrf.mxu1  ;;  %v694_v42 = vpop.f32.mrf.mxu0 }
 0x194   : > { %v3115_v43 = vsel %vm298_vm1, %v3103_v38, 0  ;;  %3683 = vmatmul.mubr.msk.bf16.vlgmr.msra.gmra.mxu0 %vm294_vm2, %v3681_v32  ;;  %3684 = vmatprep.subr.msk.bf16.mxu1 %vm298_vm1, %v3104_v40  ;;  %v740_v44 = vadd.f32 %v732_v41, %v622_v20 }
 0x195   : > { %3176 = vmatpush1.bf16.msra.mxu1 %v3115_v43  ;;  %v734_v45 = vpop.f32.mrf.mxu1  ;;  %3270 = vmatprep.mubr.bf16.mxu0 %v3757_v13 }
 0x196   : > { %v3211_v46 = vpop.permute.xlu1 %3210  ;;  %v3209_v47 = vpop.permute.xlu0 %3208 }
 0x197   : > { %v735_v48 = vpop.f32.mrf.mxu1  ;;  %v3219_v49 = vsel %vm3218_vm12, %v3209_v47, %v3211_v46 }
 0x198   : > { %3685 = vmatmul.mubr.msk.bf16.vlgmr.msra.gmra.mxu1 %vm294_vm2, %v3681_v32  ;;  %v3227_v56 = vsel %vm298_vm1, %v3219_v49, 0 }
 0x199   : > { %v807_v50 = vpop.f32.mrf.mxu0  ;;  %3311 = vmatprep.mubr.bf16.mxu1 %v3757_v13 }
 0x19a   : > { %v3215_v51 = vpop.permute.xlu1 %3214  ;;  %v3213_v52 = vpop.permute.xlu0 %3212  ;;  %v855_v53 = vadd.f32 %v807_v50, %v737_v25 }
 0x19b   : > { %v3220_v54 = vsel %vm3218_vm12, %v3211_v46, %v3213_v52  ;;  %v809_v55 = vpop.f32.mrf.mxu0  ;;  %v3221_v58 = vsel %vm3218_vm12, %v3213_v52, %v3215_v51 }
 0x19c   : > { %3687 = vmatprep.subr.msk.bf16.mxu0 %vm298_vm1, %v3220_v54  ;;  %v856_v57 = vadd.f32 %v809_v55, %v738_v31  ;;  %v3233_v3 = vsel %vm298_vm1, %v3221_v58, 0 }
 0x19d   : > { %3253 = vmatpush1.bf16.msra.mxu0 %v3227_v56  ;;  %v848_v59 = vpop.f32.mrf.mxu1  ;;  %v811_v60 = vpop.f32.mrf.mxu0 }
 0x19e   : > { %v3327_v62 = vpop.permute.xlu1 %3326  ;;  %v3217_v63 = vpop.permute.xlu0 %3216  ;;  %v857_v0 = vadd.f32 %v848_v59, %v739_v37 }
 0x19f   : > { %v3222_v1 = vsel %vm3218_vm12, %v3215_v51, %v3217_v63  ;;  %v850_v2 = vpop.f32.mrf.mxu1  ;;  %v812_v10 = vpop.f32.mrf.mxu0 }
 0x1a0   : > { %3688 = vmatmul.mubr.msk.bf16.vlgmr.msra.gmra.mxu0 %vm294_vm2, %v3686_v61  ;;  %3689 = vmatprep.subr.msk.bf16.mxu1 %vm298_vm1, %v3222_v1  ;;  %v858_v4 = vadd.f32 %v850_v2, %v740_v44 }
 0x1a1   : > { %3294 = vmatpush1.bf16.msra.mxu1 %v3233_v3  ;;  %v852_v5 = vpop.f32.mrf.mxu1  ;;  %v925_v8 = vpop.f32.mrf.mxu0  ;;  %3388 = vmatprep.mubr.bf16.mxu0 %v3757_v13 }
 0x1a2   : > { %v3331_v11 = vpop.permute.xlu1 %3330  ;;  %v3329_v6 = vpop.permute.xlu0 %3328  ;;  %v973_v7 = vadd.f32 %v925_v8, %v855_v53 }
 0x1a3   : > { %v3337_v9 = vsel %vm3336_vm13, %v3327_v62, %v3329_v6  ;;  %v3338_v12 = vsel %vm3336_vm13, %v3329_v6, %v3331_v11  ;;  %v853_v14 = vpop.f32.mrf.mxu1  ;;  %v927_v39 = vpop.f32.mrf.mxu0 }
 0x1a4   : > { %v3345_v15 = vsel %vm298_vm1, %v3337_v9, 0  ;;  %3690 = vmatmul.mubr.msk.bf16.vlgmr.msra.gmra.mxu1 %vm294_vm2, %v3686_v61  ;;  %3692 = vmatprep.subr.msk.bf16.mxu0 %vm298_vm1, %v3338_v12  ;;  %v974_v16 = vadd.f32 %v927_v39, %v856_v57 }
 0x1a5   : > { %3371 = vmatpush1.bf16.msra.mxu0 %v3345_v15  ;;  %v966_v17 = vpop.f32.mrf.mxu1  ;;  %v929_v18 = vpop.f32.mrf.mxu0  ;;  %3429 = vmatprep.mubr.bf16.mxu1 %v3757_v13 }
 0x1a6   : > { %v3335_v20 = vpop.permute.xlu1 %3334  ;;  %v3333_v21 = vpop.permute.xlu0 %3332  ;;  %v975_v22 = vadd.f32 %v966_v17, %v857_v0 }
 0x1a7   : > { %v3339_v23 = vsel %vm3336_vm13, %v3331_v11, %v3333_v21  ;;  %v3340_v24 = vsel %vm3336_vm13, %v3333_v21, %v3335_v20  ;;  %v968_v25 = vpop.f32.mrf.mxu1  ;;  %v930_v26 = vpop.f32.mrf.mxu0 }
 0x1a8   : > { %v3351_v27 = vsel %vm298_vm1, %v3339_v23, 0  ;;  %3693 = vmatmul.mubr.msk.bf16.vlgmr.msra.gmra.mxu0 %vm294_vm2, %v3691_v19  ;;  %3694 = vmatprep.subr.msk.bf16.mxu1 %vm298_vm1, %v3340_v24  ;;  %v976_v28 = vadd.f32 %v968_v25, %v858_v4 }
 0x1a9   : > { %3412 = vmatpush1.bf16.msra.mxu1 %v3351_v27  ;;  %v970_v29 = vpop.f32.mrf.mxu1 }
 0x1ab   : > { %v971_v30 = vpop.f32.mrf.mxu1 }
 0x1ac   : > { %3695 = vmatmul.mubr.msk.bf16.vlgmr.msra.gmra.mxu1 %vm294_vm2, %v3691_v19 }
 0x1ad   : > { %v1043_v13 = vpop.f32.mrf.mxu0 }
 0x1ae   : > { %v1091_v31 = vadd.f32 %v1043_v13, %v973_v7 }
 0x1af   : > { %v1045_v32 = vpop.f32.mrf.mxu0 }
 0x1b0   : > { %v1092_v33 = vadd.f32 %v1045_v32, %v974_v16 }
 0x1b1   : > { %v1047_v34 = vpop.f32.mrf.mxu0  ;;  %v1084_v35 = vpop.f32.mrf.mxu1 }
 0x1b2   : > { %v1093_v36 = vadd.f32 %v1084_v35, %v975_v22 }
 0x1b3   : > { %v1048_v37 = vpop.f32.mrf.mxu0  ;;  %v1086_v38 = vpop.f32.mrf.mxu1 }
 0x1b4   : > { %v1094_v40 = vadd.f32 %v1086_v38, %v976_v28 }
 0x1b5   : > { %v1088_v41 = vpop.f32.mrf.mxu1  ;;  %v1161_v42 = vpop.f32.mrf.mxu0 }
 0x1b6   : > { %v1209_v43 = vadd.f32 %v1161_v42, %v1091_v31 }
 0x1b7   : > { %v1089_v44 = vpop.f32.mrf.mxu1  ;;  %v1163_v45 = vpop.f32.mrf.mxu0 }
 0x1b8   : > { %v1210_v46 = vadd.f32 %v1163_v45, %v1092_v33 }
 0x1b9   : > { %v1202_v47 = vpop.f32.mrf.mxu1  ;;  %v1165_v48 = vpop.f32.mrf.mxu0 }
 0x1ba   : > { %v1211_v49 = vadd.f32 %v1202_v47, %v1093_v36 }
 0x1bb   : > { %v1204_v50 = vpop.f32.mrf.mxu1  ;;  %v1166_v51 = vpop.f32.mrf.mxu0 }
 0x1bc   : > { %v1212_v52 = vadd.f32 %v1204_v50, %v1094_v40 }
 0x1bd   : > { %v1206_v53 = vpop.f32.mrf.mxu1 }
 0x1bf   : > { %v1207_v54 = vpop.f32.mrf.mxu1 }
 0x1c1   : > { %v1279_v55 = vpop.f32.mrf.mxu0 }
 0x1c2   : > { %v1327_v56 = vadd.f32 %v1279_v55, %v1209_v43 }
 0x1c3   : > { %v1281_v57 = vpop.f32.mrf.mxu0 }
 0x1c4   : > { %v1328_v58 = vadd.f32 %v1281_v57, %v1210_v46 }
 0x1c5   : > { %v1283_v59 = vpop.f32.mrf.mxu0  ;;  %v1320_v60 = vpop.f32.mrf.mxu1 }
 0x1c6   : > { %v1329_v61 = vadd.f32 %v1320_v60, %v1211_v49 }
 0x1c7   : > { %v1284_v62 = vpop.f32.mrf.mxu0  ;;  %v1322_v63 = vpop.f32.mrf.mxu1 }
 0x1c8   : > { %v1330_v0 = vadd.f32 %v1322_v63, %v1212_v52 }
 0x1c9   : > { %v1324_v1 = vpop.f32.mrf.mxu1  ;;  %v1397_v2 = vpop.f32.mrf.mxu0 }
 0x1ca   : > { %v1445_v10 = vadd.f32 %v1397_v2, %v1327_v56 }
 0x1cb   : > { %v1325_v3 = vpop.f32.mrf.mxu1  ;;  %v1399_v4 = vpop.f32.mrf.mxu0 }
 0x1cc   : > { %v1446_v5 = vadd.f32 %v1399_v4, %v1328_v58 }
 0x1cd   : > { %v1438_v8 = vpop.f32.mrf.mxu1  ;;  %v1401_v11 = vpop.f32.mrf.mxu0 }
 0x1ce   : > { %v1447_v6 = vadd.f32 %v1438_v8, %v1329_v61 }
 0x1cf   : > { %v1440_v7 = vpop.f32.mrf.mxu1  ;;  %v1402_v9 = vpop.f32.mrf.mxu0 }
 0x1d0   : > { %v1448_v12 = vadd.f32 %v1440_v7, %v1330_v0 }
 0x1d1   : > { %v1442_v14 = vpop.f32.mrf.mxu1 }
 0x1d3   : > { %v1443_v39 = vpop.f32.mrf.mxu1 }
 0x1d5   : > { %v1515_v15 = vpop.f32.mrf.mxu0 }
 0x1d6   : > { %v1563_v16 = vadd.f32 %v1515_v15, %v1445_v10 }
 0x1d7   : > { %v1517_v17 = vpop.f32.mrf.mxu0 }
 0x1d8   : > { %v1564_v18 = vadd.f32 %v1517_v17, %v1446_v5 }
 0x1d9   : > { %v1519_v19 = vpop.f32.mrf.mxu0  ;;  %v1556_v20 = vpop.f32.mrf.mxu1 }
 0x1da   : > { %v1565_v21 = vadd.f32 %v1556_v20, %v1447_v6 }
 0x1db   : > { %v1520_v22 = vpop.f32.mrf.mxu0  ;;  %v1558_v23 = vpop.f32.mrf.mxu1 }
 0x1dc   : > { %v1566_v24 = vadd.f32 %v1558_v23, %v1448_v12 }
 0x1dd   : > { %v1560_v25 = vpop.f32.mrf.mxu1  ;;  %v1633_v26 = vpop.f32.mrf.mxu0 }
 0x1de   : > { %v1681_v27 = vadd.f32 %v1633_v26, %v1563_v16 }
 0x1df   : > { %v1561_v28 = vpop.f32.mrf.mxu1  ;;  %v1635_v29 = vpop.f32.mrf.mxu0 }
 0x1e0   : > { %v1682_v30 = vadd.f32 %v1635_v29, %v1564_v18 }
 0x1e1   : > { %v1674_v13 = vpop.f32.mrf.mxu1  ;;  %v1637_v31 = vpop.f32.mrf.mxu0 }
 0x1e2   : > { %v1683_v32 = vadd.f32 %v1674_v13, %v1565_v21 }
 0x1e3   : > { %v1676_v33 = vpop.f32.mrf.mxu1  ;;  %v1638_v34 = vpop.f32.mrf.mxu0 }
 0x1e4   : > { %v1684_v35 = vadd.f32 %v1676_v33, %v1566_v24 }
 0x1e5   : > { %v1678_v36 = vpop.f32.mrf.mxu1 }
 0x1e7   : > { %v1679_v37 = vpop.f32.mrf.mxu1 }
 0x1e9   : > { %v1751_v38 = vpop.f32.mrf.mxu0 }
 0x1ea   : > { %v1799_v40 = vadd.f32 %v1751_v38, %v1681_v27 }
 0x1eb   : > { %v1753_v41 = vpop.f32.mrf.mxu0 }
 0x1ec   : > { %v1800_v42 = vadd.f32 %v1753_v41, %v1682_v30 }
 0x1ed   : > { %v1755_v43 = vpop.f32.mrf.mxu0  ;;  %v1792_v44 = vpop.f32.mrf.mxu1 }
 0x1ee   : > { %v1801_v45 = vadd.f32 %v1792_v44, %v1683_v32 }
 0x1ef   : > { %v1756_v46 = vpop.f32.mrf.mxu0  ;;  %v1794_v47 = vpop.f32.mrf.mxu1 }
 0x1f0   : > { %v1802_v48 = vadd.f32 %v1794_v47, %v1684_v35 }
 0x1f1   : > { %v1796_v49 = vpop.f32.mrf.mxu1  ;;  %v1854_v50 = vpop.f32.mrf.mxu0 }
 0x1f2   : > { %v1902_v51 = vadd.f32 %v1854_v50, %v1799_v40 }
 0x1f3   : > { %v1797_v52 = vpop.f32.mrf.mxu1  ;;  %v1856_v53 = vpop.f32.mrf.mxu0 }
 0x1f4   : > { %v1903_v54 = vadd.f32 %v1856_v53, %v1800_v42 }
 0x1f5   : > { %v1858_v55 = vpop.f32.mrf.mxu0  ;;  %v1895_v56 = vpop.f32.mrf.mxu1 }
 0x1f6   : > { %v1904_v57 = vadd.f32 %v1895_v56, %v1801_v45 }
 0x1f7   : > { %v1859_v58 = vpop.f32.mrf.mxu0  ;;  %v1897_v59 = vpop.f32.mrf.mxu1 }
 0x1f8   : > { %v1905_v60 = vadd.f32 %v1897_v59, %v1802_v48 }
 0x1f9   : > { %v1899_v61 = vpop.f32.mrf.mxu1  ;;  %v1974_v62 = vpop.f32.mrf.mxu0 }
 0x1fa   : > { %v2022_v63 = vadd.f32 %v1974_v62, %v1902_v51 }
 0x1fb   : > { %v1900_v0 = vpop.f32.mrf.mxu1  ;;  %v1976_v1 = vpop.f32.mrf.mxu0 }
 0x1fc   : > { %v2023_v2 = vadd.f32 %v1976_v1, %v1903_v54 }
 0x1fd   : > { %v1978_v10 = vpop.f32.mrf.mxu0  ;;  %v2015_v3 = vpop.f32.mrf.mxu1 }
 0x1fe   : > { %v2024_v4 = vadd.f32 %v2015_v3, %v1904_v57 }
 0x1ff   : > { %v1979_v5 = vpop.f32.mrf.mxu0  ;;  %v2017_v8 = vpop.f32.mrf.mxu1 }
 0x200   : > { %v2025_v11 = vadd.f32 %v2017_v8, %v1905_v60 }
 0x201   : > { %v2019_v6 = vpop.f32.mrf.mxu1  ;;  %v2092_v7 = vpop.f32.mrf.mxu0 }
 0x202   : > { %v2140_v9 = vadd.f32 %v2092_v7, %v2022_v63 }
 0x203   : > { %v2020_v12 = vpop.f32.mrf.mxu1  ;;  %v2094_v14 = vpop.f32.mrf.mxu0 }
 0x204   : > { %v2141_v39 = vadd.f32 %v2094_v14, %v2023_v2 }
 0x205   : > { %v2096_v15 = vpop.f32.mrf.mxu0  ;;  %v2133_v16 = vpop.f32.mrf.mxu1 }
 0x206   : > { %v2142_v17 = vadd.f32 %v2133_v16, %v2024_v4 }
 0x207   : > { %v2097_v18 = vpop.f32.mrf.mxu0  ;;  %v2135_v19 = vpop.f32.mrf.mxu1 }
 0x208   : > { %v2143_v20 = vadd.f32 %v2135_v19, %v2025_v11 }
 0x209   : > { %v2137_v21 = vpop.f32.mrf.mxu1  ;;  %v2210_v22 = vpop.f32.mrf.mxu0 }
 0x20a   : > { %v2258_v23 = vadd.f32 %v2210_v22, %v2140_v9 }
 0x20b   : > { %v2138_v24 = vpop.f32.mrf.mxu1  ;;  %v2212_v25 = vpop.f32.mrf.mxu0 }
 0x20c   : > { %v2259_v26 = vadd.f32 %v2212_v25, %v2141_v39 }
 0x20d   : > { %v2214_v27 = vpop.f32.mrf.mxu0  ;;  %v2251_v28 = vpop.f32.mrf.mxu1 }
 0x20e   : > { %v2260_v29 = vadd.f32 %v2251_v28, %v2142_v17 }
 0x20f   : > { %v2215_v30 = vpop.f32.mrf.mxu0  ;;  %v2253_v13 = vpop.f32.mrf.mxu1 }
 0x210   : > { %v2261_v31 = vadd.f32 %v2253_v13, %v2143_v20 }
 0x211   : > { %v2255_v32 = vpop.f32.mrf.mxu1  ;;  %v2328_v33 = vpop.f32.mrf.mxu0 }
 0x212   : > { %v4399_v34 = vadd.f32 %v2328_v33, %v2258_v23 }
 0x213   : > { %v2256_v35 = vpop.f32.mrf.mxu1  ;;  %v2330_v36 = vpop.f32.mrf.mxu0 }
 0x214   : > { %v4401_v37 = vadd.f32 %v2330_v36, %v2259_v26 }
 0x215   : > { %v2332_v38 = vpop.f32.mrf.mxu0  ;;  %v2369_v40 = vpop.f32.mrf.mxu1 }
 0x216   : > { %v4403_v41 = vadd.f32 %v2369_v40, %v2260_v29 }
 0x217   : > { %v2333_v42 = vpop.f32.mrf.mxu0  ;;  %v2371_v43 = vpop.f32.mrf.mxu1 }
 0x218   : > { %v4405_v44 = vadd.f32 %v2371_v43, %v2261_v31 }
 0x219   : > { %v2373_v45 = vpop.f32.mrf.mxu1  ;;  %v2446_v46 = vpop.f32.mrf.mxu0 }
 0x21a   : > { %v2494_v35 = vadd.f32 %v2446_v46, %v4399_v34 }
 0x21b   : > { %v2374_v47 = vpop.f32.mrf.mxu1  ;;  %v2448_v48 = vpop.f32.mrf.mxu0 }
 0x21c   : > { %v2495_v40 = vadd.f32 %v2448_v48, %v4401_v37 }
 0x21d   : > { %v2487_v49 = vpop.f32.mrf.mxu1  ;;  %v2450_v50 = vpop.f32.mrf.mxu0 }
 0x21e   : > { %v2496_v45 = vadd.f32 %v2487_v49, %v4403_v41 }
 0x21f   : > { %v2489_v51 = vpop.f32.mrf.mxu1  ;;  %v2451_v52 = vpop.f32.mrf.mxu0 }
 0x221   : > { %v2491_v53 = vpop.f32.mrf.mxu1 }
 0x222   : > { %v2497_v53 = vadd.f32 %v2489_v51, %v4405_v44 }
 0x223   : > { %v2492_v54 = vpop.f32.mrf.mxu1 }
 0x224   : > { %v2564_v55 = vpop.f32.mrf.mxu0 }
 0x225   : > { %v2612_v42 = vadd.f32 %v2564_v55, %v2494_v35 }
 0x226   : > { %v2566_v56 = vpop.f32.mrf.mxu0 }
 0x227   : > { %v2613_v47 = vadd.f32 %v2566_v56, %v2495_v40 }
 0x228   : > { %v2568_v57 = vpop.f32.mrf.mxu0  ;;  %v2605_v58 = vpop.f32.mrf.mxu1 }
 0x229   : > { %v2614_v54 = vadd.f32 %v2605_v58, %v2496_v45 }
 0x22a   : > { %v2569_v59 = vpop.f32.mrf.mxu0  ;;  %v2607_v60 = vpop.f32.mrf.mxu1 }
 0x22c   : > { %v2609_v61 = vpop.f32.mrf.mxu1  ;;  %v2682_v62 = vpop.f32.mrf.mxu0 }
 0x22d   : > { %v2730_v50 = vadd.f32 %v2682_v62, %v2612_v42 }
 0x22e   : > { %v2610_v63 = vpop.f32.mrf.mxu1  ;;  %v2684_v0 = vpop.f32.mrf.mxu0 }
 0x22f   : > { %v2731_v57 = vadd.f32 %v2684_v0, %v2613_v47  ;;  %v2615_v63 = vadd.f32 %v2607_v60, %v2497_v53 }
 0x230   : > { %v2723_v1 = vpop.f32.mrf.mxu1  ;;  %v2686_v2 = vpop.f32.mrf.mxu0 }
 0x231   : > { %v2732_v2 = vadd.f32 %v2723_v1, %v2614_v54  ;;  %v3446_v1 = vpop.permute.xlu0 %3445 }
 0x232   : > { %v2725_v10 = vpop.f32.mrf.mxu1  ;;  %v2687_v3 = vpop.f32.mrf.mxu0 }
 0x234   : > { %v2727_v4 = vpop.f32.mrf.mxu1 }
 0x235   : > { %v2733_v4 = vadd.f32 %v2725_v10, %v2615_v63 }
 0x236   : > { %v2728_v5 = vpop.f32.mrf.mxu1 }
 0x238   : > { %v2800_v8 = vpop.f32.mrf.mxu0 }
 0x239   : > { %v2848_v59 = vadd.f32 %v2800_v8, %v2730_v50 }
 0x23a   : > { %v2802_v11 = vpop.f32.mrf.mxu0 }
 0x23b   : > { %v2849_v34 = vadd.f32 %v2802_v11, %v2731_v57 }
 0x23c   : > { %v2804_v6 = vpop.f32.mrf.mxu0  ;;  %v2841_v7 = vpop.f32.mrf.mxu1 }
 0x23d   : > { %v2850_v37 = vadd.f32 %v2841_v7, %v2732_v2 }
 0x23e   : > { %v2805_v9 = vpop.f32.mrf.mxu0  ;;  %v2843_v12 = vpop.f32.mrf.mxu1 }
 0x23f   : > { %v2851_v49 = vadd.f32 %v2843_v12, %v2733_v4 }
 0x240   : > { %v2845_v14 = vpop.f32.mrf.mxu1  ;;  %v2918_v39 = vpop.f32.mrf.mxu0 }
 0x241   : > { %v2966_v46 = vadd.f32 %v2918_v39, %v2848_v59 }
 0x242   : > { %v2846_v15 = vpop.f32.mrf.mxu1  ;;  %v2920_v16 = vpop.f32.mrf.mxu0 }
 0x243   : > { %v2967_v48 = vadd.f32 %v2920_v16, %v2849_v34 }
 0x244   : > { %v2959_v17 = vpop.f32.mrf.mxu1  ;;  %v2922_v18 = vpop.f32.mrf.mxu0 }
 0x245   : > { %v2968_v56 = vadd.f32 %v2959_v17, %v2850_v37 }
 0x246   : > { %v2961_v19 = vpop.f32.mrf.mxu1  ;;  %v2923_v20 = vpop.f32.mrf.mxu0 }
 0x247   : > { %v2969_v58 = vadd.f32 %v2961_v19, %v2851_v49 }
 0x248   : > { %v2963_v21 = vpop.f32.mrf.mxu1 }
 0x24a   : > { %v2964_v22 = vpop.f32.mrf.mxu1 }
 0x24c   : > { %v3036_v23 = vpop.f32.mrf.mxu0 }
 0x24d   : > { %v3084_v55 = vadd.f32 %v3036_v23, %v2966_v46 }
 0x24e   : > { %v3038_v24 = vpop.f32.mrf.mxu0 }
 0x24f   : > { %v3085_v62 = vadd.f32 %v3038_v24, %v2967_v48 }
 0x250   : > { %v3040_v25 = vpop.f32.mrf.mxu0  ;;  %v3077_v26 = vpop.f32.mrf.mxu1 }
 0x251   : > { %v3086_v0 = vadd.f32 %v3077_v26, %v2968_v56 }
 0x252   : > { %v3041_v27 = vpop.f32.mrf.mxu0  ;;  %v3079_v28 = vpop.f32.mrf.mxu1 }
 0x253   : > { %v3087_v14 = vadd.f32 %v3079_v28, %v2969_v58 }
 0x254   : > { %v3081_v29 = vpop.f32.mrf.mxu1  ;;  %v3154_v30 = vpop.f32.mrf.mxu0 }
 0x255   : > { %v3202_v6 = vadd.f32 %v3154_v30, %v3084_v55 }
 0x256   : > { %v3082_v13 = vpop.f32.mrf.mxu1  ;;  %v3156_v31 = vpop.f32.mrf.mxu0 }
 0x257   : > { %v3203_v8 = vadd.f32 %v3156_v31, %v3085_v62 }
 0x258   : > { %v3195_v32 = vpop.f32.mrf.mxu1  ;;  %v3158_v33 = vpop.f32.mrf.mxu0 }
 0x259   : > { %v3204_v10 = vadd.f32 %v3195_v32, %v3086_v0 }
 0x25a   : > { %v3197_v36 = vpop.f32.mrf.mxu1  ;;  %v3159_v38 = vpop.f32.mrf.mxu0 }
 0x25b   : > { %v3205_v12 = vadd.f32 %v3197_v36, %v3087_v14 }
 0x25c   : > { %v3199_v43 = vpop.f32.mrf.mxu1 }
 0x25e   : > { %v3200_v52 = vpop.f32.mrf.mxu1 }
 0x260   : > { %v3272_v61 = vpop.f32.mrf.mxu0 }
 0x261   : > { %v3320_v60 = vadd.f32 %v3272_v61, %v3202_v6 }
 0x262   : > { %v3274_v3 = vpop.f32.mrf.mxu0 }
 0x263   : > { %v3321_v7 = vadd.f32 %v3274_v3, %v3203_v8 }
 0x264   : > { %v3276_v5 = vpop.f32.mrf.mxu0  ;;  %v3313_v41 = vpop.f32.mrf.mxu1 }
 0x265   : > { %v3322_v17 = vadd.f32 %v3313_v41, %v3204_v10 }
 0x266   : > { %v3277_v44 = vpop.f32.mrf.mxu0  ;;  %v3315_v51 = vpop.f32.mrf.mxu1 }
 0x267   : > { %v3323_v22 = vadd.f32 %v3315_v51, %v3205_v12 }
 0x268   : > { %v3317_v11 = vpop.f32.mrf.mxu1  ;;  %v3390_v9 = vpop.f32.mrf.mxu0 }
 0x269   : > { %v3438_v39 = vadd.f32 %v3390_v9, %v3320_v60 }
 0x26a   : > { %v3318_v15 = vpop.f32.mrf.mxu1  ;;  %v3392_v16 = vpop.f32.mrf.mxu0 }
 0x26b   : > { %v3439_v18 = vadd.f32 %v3392_v16, %v3321_v7  ;;  %v3448_v20 = vadd.f32 %v3446_v1, %v3438_v39 }
 0x26c   : > { %v3431_v21 = vpop.f32.mrf.mxu1  ;;  %v3394_v19 = vpop.f32.mrf.mxu0 }
 0x26d   : > { %v3449_v23 = vadd.f32 %v3446_v1, %v3439_v18  ;;  %v3452_v24 = vmax.f32 %v3448_v20, 0.0  ;;  %v3440_v25 = vadd.f32 %v3431_v21, %v3322_v17 }
 0x26e   : > { %v3433_v26 = vpop.f32.mrf.mxu1  ;;  %v3395_v27 = vpop.f32.mrf.mxu0 }
 0x26f   : > { %v3453_v28 = vmax.f32 %v3449_v23, 0.0  ;;  %3456 = vst [vmem:[%s3817_s18] sm:$0xff] %v3452_v24  ;;  %v3450_v29 = vadd.f32 %v3446_v1, %v3440_v25  ;;  %v3441_v30 = vadd.f32 %v3433_v26, %v3323_v22 }
 0x270   : > { %v3435_v13 = vpop.f32.mrf.mxu1 }
 0x271   : > { %3457 = vst [vmem:[%s3817_s18 + $0x8] sm:$0xff] %v3453_v28  ;;  %v3454_v31 = vmax.f32 %v3450_v29, 0.0  ;;  %v3451_v32 = vadd.f32 %v3446_v1, %v3441_v30 }
 0x272   : > { %v3436_v33 = vpop.f32.mrf.mxu1 }
 0x273   : > { %3458 = vst [vmem:[%s3817_s18 + $0x10] sm:$0xff] %v3454_v31  ;;  %v3455_v35 = vmax.f32 %v3451_v32, 0.0 }
 0x275   : > { %3459 = vst [vmem:[%s3817_s18 + $0x18] sm:$0xff] %v3455_v35 }
 0x276 PF: > { %s13_s12 = sadd.s32 1, %s3754_s12  }
 0x277   : > { %p10_p8 = scmp.ge.s32.totalorder %s13_s12, 6  }
 0x279   :  { %12 = sbr.rel (!%p10_p8) target bundleno = 1 (0x1), region = 179 }
 0x27e   :  { %3482 = vsyncmov [#allocation3] }
 0x281   :  { %s3483_s27 = vpop.sfrf %3482 }
 0x282   :  { %p3698_p9 = scmp.ne.s32.totalorder %s3483_s27, 0 }
 0x284   :  { %3487 = shalt.err (%p3698_p9)  }
 0x285   :  { %3489 = vsyncmov [#allocation3 + $0x1] }
 0x288   :  { %s3490_s28 = vpop.sfrf %3489 }
 0x289   :  { %p3699_p10 = scmp.ne.s32.totalorder %s3490_s28, 0 }
 0x28b   :  { %3494 = shalt.err (%p3699_p10)  }

</bundles_post_ra>
